<compile_context>
chip_gen: v6e
topology: v6e:2x2x1
jax: 0.10.0
libtpu: 0.0.40
codegen_flags: <defaults>
</compile_context>

<pallas_src>
import functools

import jax
import jax.numpy as jnp
from jax.experimental import pallas as pl
from jax.experimental.pallas import tpu as pltpu

EPS = 1e-5
_SQRT_2_OVER_PI = 0.7978845608028654


def _gelu(v):
    # Tanh-approximate GELU (lowers to the EUP tanh unit).
    # TODO(synk): torch nn.GELU() default is the exact erf form; switch to erf
    # if bit-parity with torch is required (max abs deviation ~1e-3).
    return 0.5 * v * (1.0 + jnp.tanh(_SQRT_2_OVER_PI * (v + 0.044715 * v * v * v)))


# ---------------------------------------------------------------------------
# Style MLP: Linear(slot_dim -> 6C) -> LayerNorm(6C) -> GELU -> Linear(6C -> 6C)
# ---------------------------------------------------------------------------
def _style_mlp_kernel(slot_ref, w1_ref, b1_ref, lnw_ref, lnb_ref, w2_ref, b2_ref,
                      o_ref):
    slot = slot_ref[...].astype(jnp.float32)                          # (B, S)
    h = jnp.dot(slot, w1_ref[...].astype(jnp.float32),
                preferred_element_type=jnp.float32)
    h = h + b1_ref[...].astype(jnp.float32)                           # (B, 6C)

    # LayerNorm over the feature (lane) axis — single pass, biased variance.
    n = h.shape[-1]
    s1 = jnp.sum(h, axis=-1, keepdims=True)
    s2 = jnp.sum(h * h, axis=-1, keepdims=True)
    mean = s1 * (1.0 / n)
    var = jnp.maximum(s2 * (1.0 / n) - mean * mean, 0.0)
    h = (h - mean) * jax.lax.rsqrt(var + EPS)
    h = h * lnw_ref[...].astype(jnp.float32) + lnb_ref[...].astype(jnp.float32)
    h = _gelu(h)

    out = jnp.dot(h, w2_ref[...].astype(jnp.float32),
                  preferred_element_type=jnp.float32)
    out = out + b2_ref[...].astype(jnp.float32)
    o_ref[...] = out.astype(o_ref.dtype)


def style_mlp(slot, w1, b1, ln_w, ln_b, w2, b2):
    batch = slot.shape[0]
    out_dim = w1.shape[1]
    # Tiny problem: whole-array blocks, single kernel invocation.
    return pl.pallas_call(
        _style_mlp_kernel,
        out_shape=jax.ShapeDtypeStruct((batch, out_dim), jnp.float32),
    )(slot, w1, b1.reshape(1, -1), ln_w.reshape(1, -1),
      ln_b.reshape(1, -1), w2, b2.reshape(1, -1))


# ---------------------------------------------------------------------------
# Fused conv3x3 -> IN -> modulate -> GELU -> conv3x3 -> IN -> modulate ->
# residual -> GELU -> IN -> modulate, one batch element per grid step.
# ---------------------------------------------------------------------------
def _basic_block_kernel(x_ref, style_ref, mask_ref, w1_ref, w2_ref, o_ref,
                        *, w_dim):
    C = x_ref.shape[1]
    HW = x_ref.shape[2]
    x = x_ref[0].astype(jnp.float32)                                  # (C, HW)

    # Per-tap pad=1 boundary masks, loaded from VMEM once and reused by both
    # convs.  The center tap (t == 4) needs no mask.
    masks = [None if t == 4 else mask_ref[t] for t in range(9)]       # (1, HW)

    def conv3x3(inp, w_taps_ref):
        # 9 lane-rolled, boundary-masked MXU contractions (Cout,Cin)@(Cin,HW).
        # Conv bias is intentionally omitted: the InstanceNorm that always
        # follows subtracts the per-channel mean, making a per-channel bias an
        # exact no-op on the block output.
        acc = None
        for t in range(9):                                            # unrolled taps
            dy = t // 3 - 1
            dx = t % 3 - 1
            off = dy * w_dim + dx
            if off == 0:
                xs = inp
            else:
                # xs[:, p] = inp[:, p + off] (wrap killed by the 0/1 mask).
                xs = pltpu.roll(inp, shift=(-off) % HW, axis=1)       # XLU slot
                xs = xs * masks[t]                                    # (1, HW) bcast
            tap = jnp.dot(w_taps_ref[t].astype(jnp.float32), xs,
                          preferred_element_type=jnp.float32)
            acc = tap if acc is None else acc + tap
        return acc

    def instance_norm(v):
        # Per-channel stats over the spatial (lane) axis, single pass, biased.
        s1 = jnp.sum(v, axis=-1, keepdims=True)
        s2 = jnp.sum(v * v, axis=-1, keepdims=True)
        mean = s1 * (1.0 / HW)
        var = jnp.maximum(s2 * (1.0 / HW) - mean * mean, 0.0)
        return (v - mean) * jax.lax.rsqrt(var + EPS)

    def modulate(v, gain_idx, bias_idx):
        g = style_ref[0, gain_idx].astype(jnp.float32)                # (C, 1)
        b = style_ref[0, bias_idx].astype(jnp.float32)                # (C, 1)
        return (1.0 + g) * v + b

    h = conv3x3(x, w1_ref)
    h = _gelu(modulate(instance_norm(h), 0, 1))
    h = conv3x3(h, w2_ref)
    h = modulate(instance_norm(h), 2, 3)
    h = _gelu(x + h)
    h = modulate(instance_norm(h), 4, 5)
    o_ref[0] = h.astype(o_ref.dtype)


def basic_block_forward(x, slot, params, upsample=False):
    """Forward pass of BasicBlock (upsample=False -> nn.Identity tail)."""
    B, C, H, Wd = x.shape
    HW = H * Wd

    # Style MLP -> (B, 6C) -> (B, 6, C, 1): chunk k, channel c broadcasts along
    # lanes inside the kernel.  Pure reshape, no copies.
    style = style_mlp(slot, params["style_w1"], params["style_b1"],
                      params["style_ln_w"], params["style_ln_b"],
                      params["style_w2"], params["style_b2"])
    style = style.reshape(B, 6, C, 1)

    # Conv weights as (9, Cout, Cin) tap matrices.  conv1_b / conv2_b are not
    # used: they are exactly absorbed by the following InstanceNorm layers.
    def _taps(w):
        return jnp.transpose(w, (2, 3, 0, 1)).reshape(9, C, C)

    w1t, w2t = _taps(params["conv1_w"]), _taps(params["conv2_w"])

    # Per-tap validity masks (pad=1 boundary handling) on the flattened HW
    # axis.  Shape-only constants: folded at compile time, fetched once.
    hh, ww = jnp.meshgrid(jnp.arange(H), jnp.arange(Wd), indexing="ij")
    hh = hh.reshape(1, HW)
    ww = ww.reshape(1, HW)
    masks = []
    for t in range(9):
        dy, dx = t // 3 - 1, t % 3 - 1
        m = (hh + dy >= 0) & (hh + dy < H) & (ww + dx >= 0) & (ww + dx < Wd)
        masks.append(m.astype(jnp.float32))
    tap_masks = jnp.stack(masks, axis=0)                              # (9, 1, HW)

    x_flat = x.reshape(B, C, HW)      # NCHW -> (B, C, HW): free, no transpose

    kernel = functools.partial(_basic_block_kernel, w_dim=Wd)
    out_flat = pl.pallas_call(
        kernel,
        out_shape=jax.ShapeDtypeStruct((B, C, HW), x.dtype),
        grid_spec=pltpu.PrefetchScalarGridSpec(
            num_scalar_prefetch=0,
            grid=(B,),
            in_specs=[
                pl.BlockSpec((1, C, HW), lambda b: (b, 0, 0)),
                pl.BlockSpec((1, 6, C, 1), lambda b: (b, 0, 0, 0)),
                pl.BlockSpec((9, 1, HW), lambda b: (0, 0, 0)),
                pl.BlockSpec((9, C, C), lambda b: (0, 0, 0)),
                pl.BlockSpec((9, C, C), lambda b: (0, 0, 0)),
            ],
            out_specs=pl.BlockSpec((1, C, HW), lambda b: (b, 0, 0)),
        ),
        compiler_params=pltpu.CompilerParams(
            dimension_semantics=("parallel",),
        ),
        cost_estimate=pl.CostEstimate(
            flops=B * (2 * 9 * 2 * C * C * HW + 40 * C * HW),
            transcendentals=2 * B * C * HW,
            bytes_accessed=4 * (2 * B * C * HW + 18 * C * C
                                + 6 * B * C + 9 * HW),
        ),
    )(x_flat, style, tap_masks, w1t, w2t)

    out = out_flat.reshape(B, C, H, Wd)
    if upsample:
        # TODO(synk): upsample=True tail (1x1 conv + 2x bilinear upsample) not
        # implemented; the tested configuration uses nn.Identity.
        raise NotImplementedError("upsample=True path not implemented")
    return out


# ---------------------------------------------------------------------------
# Pure-JAX reference (mirrors the torch module; HIGHEST precision).
# ---------------------------------------------------------------------------
def _reference(x, slot, params):
    HI = jax.lax.Precision.HIGHEST

    h = jnp.dot(slot, params["style_w1"], precision=HI) + params["style_b1"]
    mean = h.mean(-1, keepdims=True)
    var = ((h - mean) ** 2).mean(-1, keepdims=True)
    h = (h - mean) / jnp.sqrt(var + EPS)
    h = h * params["style_ln_w"] + params["style_ln_b"]
    h = _gelu(h)
    style = jnp.dot(h, params["style_w2"], precision=HI) + params["style_b2"]
    g1, b1, g2, b2, g3, b3 = jnp.split(style, 6, axis=-1)

    def conv(v, w, b):
        y = jax.lax.conv_general_dilated(
            v, w, window_strides=(1, 1), padding="SAME",
            dimension_numbers=("NCHW", "OIHW", "NCHW"), precision=HI)
        return y + b[None, :, None, None]

    def inorm(v):
        m = v.mean(axis=(2, 3), keepdims=True)
        va = v.var(axis=(2, 3), keepdims=True)
        return (v - m) / jnp.sqrt(va + EPS)

    def mod(v, g, bb):
        return (1.0 + g)[:, :, None, None] * v + bb[:, :, None, None]

    out = conv(x, params["conv1_w"], params["conv1_b"])
    out = _gelu(mod(inorm(out), g1, b1))
    out = conv(out, params["conv2_w"], params["conv2_b"])
    out = mod(inorm(out), g2, b2)
    out = _gelu(x + out)
    out = mod(inorm(out), g3, b3)
    return out


if __name__ == "__main__":
    B, C, H, W = 2, 4, 16, 16           # planes = 4, 16x16 feature map
    SLOT_DIM = 32
    SIX_C = 6 * C

    key = jax.random.PRNGKey(0)
    ks = jax.random.split(key, 12)

    def init(k, shape, scale):
        return scale * jax.random.normal(k, shape, dtype=jnp.float32)

    x = jax.random.normal(ks[0], (B, C, H, W), dtype=jnp.float32)
    slot = jax.random.normal(ks[1], (B, SLOT_DIM), dtype=jnp.float32)

    params = {
        "style_w1": init(ks[2], (SLOT_DIM, SIX_C), SLOT_DIM ** -0.5),
        "style_b1": init(ks[3], (SIX_C,), 0.05),
        "style_ln_w": 1.0 + init(ks[4], (SIX_C,), 0.1),
        "style_ln_b": init(ks[5], (SIX_C,), 0.1),
        "style_w2": init(ks[6], (SIX_C, SIX_C), SIX_C ** -0.5),
        "style_b2": init(ks[7], (SIX_C,), 0.05),
        "conv1_w": init(ks[8], (C, C, 3, 3), (9 * C) ** -0.5),
        "conv1_b": init(ks[9], (C,), 0.05),
        "conv2_w": init(ks[10], (C, C, 3, 3), (9 * C) ** -0.5),
        "conv2_b": init(ks[11], (C,), 0.05),
    }

    out = jax.jit(basic_block_forward)(x, slot, params)
    out = jax.block_until_ready(out)

    ref = _reference(x, slot, params)
    assert out.shape == (B, C, H, W)
    err = float(jnp.max(jnp.abs(out - ref)))
    # Bound covers MXU default-precision f32 matmul differences vs the
    # HIGHEST-precision XLA reference; typical observed error is far smaller,
    # while any semantic bug produces O(1) discrepancies.
    assert err < 2e-2, f"mismatch vs reference: max abs err = {err}"

    print("KERNEL_OK")
</pallas_src>

<mosaic_0001>
module attributes {stable_mosaic.version = 11 : i64} {
  func.func @_style_mlp_kernel(%arg0: memref<2x32xf32, #tpu.memory_space<vmem>>, %arg1: memref<32x24xf32, #tpu.memory_space<vmem>>, %arg2: memref<1x24xf32, #tpu.memory_space<vmem>>, %arg3: memref<1x24xf32, #tpu.memory_space<vmem>>, %arg4: memref<1x24xf32, #tpu.memory_space<vmem>>, %arg5: memref<24x24xf32, #tpu.memory_space<vmem>>, %arg6: memref<1x24xf32, #tpu.memory_space<vmem>>, %arg7: memref<2x24xf32, #tpu.memory_space<vmem>>) attributes {dimension_semantics = [], scalar_prefetch = 0 : i64, scratch_operands = 0 : i64, tpu.core_type = #tpu.core_type<tc>} {
    %c0 = arith.constant 0 : index
    %c0_0 = arith.constant 0 : index
    %0 = vector.load %arg0[%c0, %c0_0] : memref<2x32xf32, #tpu.memory_space<vmem>>, vector<2x32xf32>
    %c0_1 = arith.constant 0 : index
    %c0_2 = arith.constant 0 : index
    %1 = vector.load %arg1[%c0_1, %c0_2] : memref<32x24xf32, #tpu.memory_space<vmem>>, vector<32x24xf32>
    %cst = arith.constant dense<0.000000e+00> : vector<2x24xf32>
    %2 = tpu.matmul %0, %1, %cst {dimension_numbers = #tpu.dot_dimension_numbers<[1], [0], [0], [1], [0, 0, 1, 1], [], []>} : vector<2x32xf32>, vector<32x24xf32>, vector<2x24xf32> -> vector<2x24xf32>
    %c0_3 = arith.constant 0 : index
    %c0_4 = arith.constant 0 : index
    %3 = vector.load %arg2[%c0_3, %c0_4] : memref<1x24xf32, #tpu.memory_space<vmem>>, vector<1x24xf32>
    %4 = vector.broadcast %3 : vector<1x24xf32> to vector<2x24xf32>
    %5 = arith.addf %2, %4 : vector<2x24xf32>
    %cst_5 = arith.constant dense<0.000000e+00> : vector<2xf32>
    %6 = vector.multi_reduction <add>, %5, %cst_5 [1] : vector<2x24xf32> to vector<2xf32>
    %7 = vector.shape_cast %6 : vector<2xf32> to vector<2x1xf32>
    %8 = arith.mulf %5, %5 : vector<2x24xf32>
    %cst_6 = arith.constant dense<0.000000e+00> : vector<2xf32>
    %9 = vector.multi_reduction <add>, %8, %cst_6 [1] : vector<2x24xf32> to vector<2xf32>
    %10 = vector.shape_cast %9 : vector<2xf32> to vector<2x1xf32>
    %cst_7 = arith.constant 0.0416666679 : f32
    %11 = vector.broadcast %cst_7 : f32 to vector<2x1xf32>
    %12 = arith.mulf %7, %11 : vector<2x1xf32>
    %cst_8 = arith.constant 0.0416666679 : f32
    %13 = vector.broadcast %cst_8 : f32 to vector<2x1xf32>
    %14 = arith.mulf %10, %13 : vector<2x1xf32>
    %15 = arith.mulf %12, %12 : vector<2x1xf32>
    %16 = arith.subf %14, %15 : vector<2x1xf32>
    %cst_9 = arith.constant 0.000000e+00 : f32
    %17 = vector.broadcast %cst_9 : f32 to vector<2x1xf32>
    %18 = arith.maximumf %16, %17 : vector<2x1xf32>
    %19 = vector.broadcast %12 : vector<2x1xf32> to vector<2x24xf32>
    %20 = arith.subf %5, %19 : vector<2x24xf32>
    %cst_10 = arith.constant 9.99999974E-6 : f32
    %21 = vector.broadcast %cst_10 : f32 to vector<2x1xf32>
    %22 = arith.addf %18, %21 : vector<2x1xf32>
    %23 = math.rsqrt %22 : vector<2x1xf32>
    %24 = vector.broadcast %23 : vector<2x1xf32> to vector<2x24xf32>
    %25 = arith.mulf %20, %24 : vector<2x24xf32>
    %c0_11 = arith.constant 0 : index
    %c0_12 = arith.constant 0 : index
    %26 = vector.load %arg3[%c0_11, %c0_12] : memref<1x24xf32, #tpu.memory_space<vmem>>, vector<1x24xf32>
    %27 = vector.broadcast %26 : vector<1x24xf32> to vector<2x24xf32>
    %28 = arith.mulf %25, %27 : vector<2x24xf32>
    %c0_13 = arith.constant 0 : index
    %c0_14 = arith.constant 0 : index
    %29 = vector.load %arg4[%c0_13, %c0_14] : memref<1x24xf32, #tpu.memory_space<vmem>>, vector<1x24xf32>
    %30 = vector.broadcast %29 : vector<1x24xf32> to vector<2x24xf32>
    %31 = arith.addf %28, %30 : vector<2x24xf32>
    %cst_15 = arith.constant 5.000000e-01 : f32
    %32 = vector.broadcast %cst_15 : f32 to vector<2x24xf32>
    %33 = arith.mulf %32, %31 : vector<2x24xf32>
    %cst_16 = arith.constant 4.471500e-02 : f32
    %34 = vector.broadcast %cst_16 : f32 to vector<2x24xf32>
    %35 = arith.mulf %34, %31 : vector<2x24xf32>
    %36 = arith.mulf %35, %31 : vector<2x24xf32>
    %37 = arith.mulf %36, %31 : vector<2x24xf32>
    %38 = arith.addf %31, %37 : vector<2x24xf32>
    %cst_17 = arith.constant 0.797884583 : f32
    %39 = vector.broadcast %cst_17 : f32 to vector<2x24xf32>
    %40 = arith.mulf %39, %38 : vector<2x24xf32>
    %41 = math.tanh %40 : vector<2x24xf32>
    %cst_18 = arith.constant 1.000000e+00 : f32
    %42 = vector.broadcast %cst_18 : f32 to vector<2x24xf32>
    %43 = arith.addf %42, %41 : vector<2x24xf32>
    %44 = arith.mulf %33, %43 : vector<2x24xf32>
    %c0_19 = arith.constant 0 : index
    %c0_20 = arith.constant 0 : index
    %45 = vector.load %arg5[%c0_19, %c0_20] : memref<24x24xf32, #tpu.memory_space<vmem>>, vector<24x24xf32>
    %cst_21 = arith.constant dense<0.000000e+00> : vector<2x24xf32>
    %46 = tpu.matmul %44, %45, %cst_21 {dimension_numbers = #tpu.dot_dimension_numbers<[1], [0], [0], [1], [0, 0, 1, 1], [], []>} : vector<2x24xf32>, vector<24x24xf32>, vector<2x24xf32> -> vector<2x24xf32>
    %c0_22 = arith.constant 0 : index
    %c0_23 = arith.constant 0 : index
    %47 = vector.load %arg6[%c0_22, %c0_23] : memref<1x24xf32, #tpu.memory_space<vmem>>, vector<1x24xf32>
    %48 = vector.broadcast %47 : vector<1x24xf32> to vector<2x24xf32>
    %49 = arith.addf %46, %48 : vector<2x24xf32>
    %c0_24 = arith.constant 0 : index
    %c0_25 = arith.constant 0 : index
    %50 = vector.load %arg7[%c0_24, %c0_25] : memref<2x24xf32, #tpu.memory_space<vmem>>, vector<2x24xf32>
    tpu.vector_store %arg7[%c0_24, %c0_25], %49 {strides = array<i32>} : memref<2x24xf32, #tpu.memory_space<vmem>>, vector<2x24xf32>,
    return
  }
}

module attributes {stable_mosaic.version = 11 : i64} {
  func.func @_basic_block_kernel(%arg0: i32, %arg1: memref<1x4x256xf32, #tpu.memory_space<vmem>>, %arg2: memref<1x6x4x1xf32, #tpu.memory_space<vmem>>, %arg3: memref<9x1x256xf32, #tpu.memory_space<vmem>>, %arg4: memref<9x4x4xf32, #tpu.memory_space<vmem>>, %arg5: memref<9x4x4xf32, #tpu.memory_space<vmem>>, %arg6: memref<1x4x256xf32, #tpu.memory_space<vmem>>) attributes {dimension_semantics = [#tpu.dimension_semantics<parallel>], iteration_bounds = array<i64: 2>, scalar_prefetch = 0 : i64, scratch_operands = 0 : i64, tpu.core_type = #tpu.core_type<tc>, window_params = [{transform_indices = @transform_0, window_bounds = array<i64: 1, 4, 256>}, {transform_indices = @transform_1, window_bounds = array<i64: 1, 6, 4, 1>}, {pipeline_mode = #tpu.pipeline_mode<synchronous>, transform_indices = @transform_2, window_bounds = array<i64: 9, 1, 256>}, {pipeline_mode = #tpu.pipeline_mode<synchronous>, transform_indices = @transform_3, window_bounds = array<i64: 9, 4, 4>}, {pipeline_mode = #tpu.pipeline_mode<synchronous>, transform_indices = @transform_4, window_bounds = array<i64: 9, 4, 4>}, {transform_indices = @transform_5, window_bounds = array<i64: 1, 4, 256>}]} {
    %c0 = arith.constant 0 : index
    %c0_0 = arith.constant 0 : index
    %c0_1 = arith.constant 0 : index
    %0 = vector.load %arg1[%c0, %c0_0, %c0_1] : memref<1x4x256xf32, #tpu.memory_space<vmem>>, vector<1x4x256xf32>
    %1 = vector.shape_cast %0 : vector<1x4x256xf32> to vector<4x256xf32>
    %c0_2 = arith.constant 0 : index
    %c0_3 = arith.constant 0 : index
    %c0_4 = arith.constant 0 : index
    %2 = vector.load %arg3[%c0_2, %c0_3, %c0_4] : memref<9x1x256xf32, #tpu.memory_space<vmem>>, vector<1x1x256xf32>
    %3 = vector.shape_cast %2 : vector<1x1x256xf32> to vector<1x256xf32>
    %c1 = arith.constant 1 : index
    %c0_5 = arith.constant 0 : index
    %c0_6 = arith.constant 0 : index
    %4 = vector.load %arg3[%c1, %c0_5, %c0_6] : memref<9x1x256xf32, #tpu.memory_space<vmem>>, vector<1x1x256xf32>
    %5 = vector.shape_cast %4 : vector<1x1x256xf32> to vector<1x256xf32>
    %c2 = arith.constant 2 : index
    %c0_7 = arith.constant 0 : index
    %c0_8 = arith.constant 0 : index
    %6 = vector.load %arg3[%c2, %c0_7, %c0_8] : memref<9x1x256xf32, #tpu.memory_space<vmem>>, vector<1x1x256xf32>
    %7 = vector.shape_cast %6 : vector<1x1x256xf32> to vector<1x256xf32>
    %c3 = arith.constant 3 : index
    %c0_9 = arith.constant 0 : index
    %c0_10 = arith.constant 0 : index
    %8 = vector.load %arg3[%c3, %c0_9, %c0_10] : memref<9x1x256xf32, #tpu.memory_space<vmem>>, vector<1x1x256xf32>
    %9 = vector.shape_cast %8 : vector<1x1x256xf32> to vector<1x256xf32>
    %c5 = arith.constant 5 : index
    %c0_11 = arith.constant 0 : index
    %c0_12 = arith.constant 0 : index
    %10 = vector.load %arg3[%c5, %c0_11, %c0_12] : memref<9x1x256xf32, #tpu.memory_space<vmem>>, vector<1x1x256xf32>
    %11 = vector.shape_cast %10 : vector<1x1x256xf32> to vector<1x256xf32>
    %c6 = arith.constant 6 : index
    %c0_13 = arith.constant 0 : index
    %c0_14 = arith.constant 0 : index
    %12 = vector.load %arg3[%c6, %c0_13, %c0_14] : memref<9x1x256xf32, #tpu.memory_space<vmem>>, vector<1x1x256xf32>
    %13 = vector.shape_cast %12 : vector<1x1x256xf32> to vector<1x256xf32>
    %c7 = arith.constant 7 : index
    %c0_15 = arith.constant 0 : index
    %c0_16 = arith.constant 0 : index
    %14 = vector.load %arg3[%c7, %c0_15, %c0_16] : memref<9x1x256xf32, #tpu.memory_space<vmem>>, vector<1x1x256xf32>
    %15 = vector.shape_cast %14 : vector<1x1x256xf32> to vector<1x256xf32>
    %c8 = arith.constant 8 : index
    %c0_17 = arith.constant 0 : index
    %c0_18 = arith.constant 0 : index
    %16 = vector.load %arg3[%c8, %c0_17, %c0_18] : memref<9x1x256xf32, #tpu.memory_space<vmem>>, vector<1x1x256xf32>
    %17 = vector.shape_cast %16 : vector<1x1x256xf32> to vector<1x256xf32>
    %c17_i32 = arith.constant 17 : i32
    %18 = tpu.dynamic_rotate %1 by %c17_i32 dim 1 : vector<4x256xf32>, i32 -> vector<4x256xf32>
    %19 = vector.broadcast %3 : vector<1x256xf32> to vector<4x256xf32>
    %20 = arith.mulf %18, %19 : vector<4x256xf32>
    %c0_19 = arith.constant 0 : index
    %c0_20 = arith.constant 0 : index
    %c0_21 = arith.constant 0 : index
    %21 = vector.load %arg4[%c0_19, %c0_20, %c0_21] : memref<9x4x4xf32, #tpu.memory_space<vmem>>, vector<1x4x4xf32>
    %22 = vector.shape_cast %21 : vector<1x4x4xf32> to vector<4x4xf32>
    %cst = arith.constant dense<0.000000e+00> : vector<4x256xf32>
    %23 = tpu.matmul %22, %20, %cst {dimension_numbers = #tpu.dot_dimension_numbers<[1], [0], [0], [1], [0, 0, 1, 1], [], []>} : vector<4x4xf32>, vector<4x256xf32>, vector<4x256xf32> -> vector<4x256xf32>
    %c16_i32 = arith.constant 16 : i32
    %24 = tpu.dynamic_rotate %1 by %c16_i32 dim 1 : vector<4x256xf32>, i32 -> vector<4x256xf32>
    %25 = vector.broadcast %5 : vector<1x256xf32> to vector<4x256xf32>
    %26 = arith.mulf %24, %25 : vector<4x256xf32>
    %c1_22 = arith.constant 1 : index
    %c0_23 = arith.constant 0 : index
    %c0_24 = arith.constant 0 : index
    %27 = vector.load %arg4[%c1_22, %c0_23, %c0_24] : memref<9x4x4xf32, #tpu.memory_space<vmem>>, vector<1x4x4xf32>
    %28 = vector.shape_cast %27 : vector<1x4x4xf32> to vector<4x4xf32>
    %cst_25 = arith.constant dense<0.000000e+00> : vector<4x256xf32>
    %29 = tpu.matmul %28, %26, %cst_25 {dimension_numbers = #tpu.dot_dimension_numbers<[1], [0], [0], [1], [0, 0, 1, 1], [], []>} : vector<4x4xf32>, vector<4x256xf32>, vector<4x256xf32> -> vector<4x256xf32>
    %30 = arith.addf %23, %29 : vector<4x256xf32>
    %c15_i32 = arith.constant 15 : i32
    %31 = tpu.dynamic_rotate %1 by %c15_i32 dim 1 : vector<4x256xf32>, i32 -> vector<4x256xf32>
    %32 = vector.broadcast %7 : vector<1x256xf32> to vector<4x256xf32>
    %33 = arith.mulf %31, %32 : vector<4x256xf32>
    %c2_26 = arith.constant 2 : index
    %c0_27 = arith.constant 0 : index
    %c0_28 = arith.constant 0 : index
    %34 = vector.load %arg4[%c2_26, %c0_27, %c0_28] : memref<9x4x4xf32, #tpu.memory_space<vmem>>, vector<1x4x4xf32>
    %35 = vector.shape_cast %34 : vector<1x4x4xf32> to vector<4x4xf32>
    %cst_29 = arith.constant dense<0.000000e+00> : vector<4x256xf32>
    %36 = tpu.matmul %35, %33, %cst_29 {dimension_numbers = #tpu.dot_dimension_numbers<[1], [0], [0], [1], [0, 0, 1, 1], [], []>} : vector<4x4xf32>, vector<4x256xf32>, vector<4x256xf32> -> vector<4x256xf32>
    %37 = arith.addf %30, %36 : vector<4x256xf32>
    %c1_i32 = arith.constant 1 : i32
    %38 = tpu.dynamic_rotate %1 by %c1_i32 dim 1 : vector<4x256xf32>, i32 -> vector<4x256xf32>
    %39 = vector.broadcast %9 : vector<1x256xf32> to vector<4x256xf32>
    %40 = arith.mulf %38, %39 : vector<4x256xf32>
    %c3_30 = arith.constant 3 : index
    %c0_31 = arith.constant 0 : index
    %c0_32 = arith.constant 0 : index
    %41 = vector.load %arg4[%c3_30, %c0_31, %c0_32] : memref<9x4x4xf32, #tpu.memory_space<vmem>>, vector<1x4x4xf32>
    %42 = vector.shape_cast %41 : vector<1x4x4xf32> to vector<4x4xf32>
    %cst_33 = arith.constant dense<0.000000e+00> : vector<4x256xf32>
    %43 = tpu.matmul %42, %40, %cst_33 {dimension_numbers = #tpu.dot_dimension_numbers<[1], [0], [0], [1], [0, 0, 1, 1], [], []>} : vector<4x4xf32>, vector<4x256xf32>, vector<4x256xf32> -> vector<4x256xf32>
    %44 = arith.addf %37, %43 : vector<4x256xf32>
    %c4 = arith.constant 4 : index
    %c0_34 = arith.constant 0 : index
    %c0_35 = arith.constant 0 : index
    %45 = vector.load %arg4[%c4, %c0_34, %c0_35] : memref<9x4x4xf32, #tpu.memory_space<vmem>>, vector<1x4x4xf32>
    %46 = vector.shape_cast %45 : vector<1x4x4xf32> to vector<4x4xf32>
    %cst_36 = arith.constant dense<0.000000e+00> : vector<4x256xf32>
    %47 = tpu.matmul %46, %1, %cst_36 {dimension_numbers = #tpu.dot_dimension_numbers<[1], [0], [0], [1], [0, 0, 1, 1], [], []>} : vector<4x4xf32>, vector<4x256xf32>, vector<4x256xf32> -> vector<4x256xf32>
    %48 = arith.addf %44, %47 : vector<4x256xf32>
    %c255_i32 = arith.constant 255 : i32
    %49 = tpu.dynamic_rotate %1 by %c255_i32 dim 1 : vector<4x256xf32>, i32 -> vector<4x256xf32>
    %50 = vector.broadcast %11 : vector<1x256xf32> to vector<4x256xf32>
    %51 = arith.mulf %49, %50 : vector<4x256xf32>
    %c5_37 = arith.constant 5 : index
    %c0_38 = arith.constant 0 : index
    %c0_39 = arith.constant 0 : index
    %52 = vector.load %arg4[%c5_37, %c0_38, %c0_39] : memref<9x4x4xf32, #tpu.memory_space<vmem>>, vector<1x4x4xf32>
    %53 = vector.shape_cast %52 : vector<1x4x4xf32> to vector<4x4xf32>
    %cst_40 = arith.constant dense<0.000000e+00> : vector<4x256xf32>
    %54 = tpu.matmul %53, %51, %cst_40 {dimension_numbers = #tpu.dot_dimension_numbers<[1], [0], [0], [1], [0, 0, 1, 1], [], []>} : vector<4x4xf32>, vector<4x256xf32>, vector<4x256xf32> -> vector<4x256xf32>
    %55 = arith.addf %48, %54 : vector<4x256xf32>
    %c241_i32 = arith.constant 241 : i32
    %56 = tpu.dynamic_rotate %1 by %c241_i32 dim 1 : vector<4x256xf32>, i32 -> vector<4x256xf32>
    %57 = vector.broadcast %13 : vector<1x256xf32> to vector<4x256xf32>
    %58 = arith.mulf %56, %57 : vector<4x256xf32>
    %c6_41 = arith.constant 6 : index
    %c0_42 = arith.constant 0 : index
    %c0_43 = arith.constant 0 : index
    %59 = vector.load %arg4[%c6_41, %c0_42, %c0_43] : memref<9x4x4xf32, #tpu.memory_space<vmem>>, vector<1x4x4xf32>
    %60 = vector.shape_cast %59 : vector<1x4x4xf32> to vector<4x4xf32>
    %cst_44 = arith.constant dense<0.000000e+00> : vector<4x256xf32>
    %61 = tpu.matmul %60, %58, %cst_44 {dimension_numbers = #tpu.dot_dimension_numbers<[1], [0], [0], [1], [0, 0, 1, 1], [], []>} : vector<4x4xf32>, vector<4x256xf32>, vector<4x256xf32> -> vector<4x256xf32>
    %62 = arith.addf %55, %61 : vector<4x256xf32>
    %c240_i32 = arith.constant 240 : i32
    %63 = tpu.dynamic_rotate %1 by %c240_i32 dim 1 : vector<4x256xf32>, i32 -> vector<4x256xf32>
    %64 = vector.broadcast %15 : vector<1x256xf32> to vector<4x256xf32>
    %65 = arith.mulf %63, %64 : vector<4x256xf32>
    %c7_45 = arith.constant 7 : index
    %c0_46 = arith.constant 0 : index
    %c0_47 = arith.constant 0 : index
    %66 = vector.load %arg4[%c7_45, %c0_46, %c0_47] : memref<9x4x4xf32, #tpu.memory_space<vmem>>, vector<1x4x4xf32>
    %67 = vector.shape_cast %66 : vector<1x4x4xf32> to vector<4x4xf32>
    %cst_48 = arith.constant dense<0.000000e+00> : vector<4x256xf32>
    %68 = tpu.matmul %67, %65, %cst_48 {dimension_numbers = #tpu.dot_dimension_numbers<[1], [0], [0], [1], [0, 0, 1, 1], [], []>} : vector<4x4xf32>, vector<4x256xf32>, vector<4x256xf32> -> vector<4x256xf32>
    %69 = arith.addf %62, %68 : vector<4x256xf32>
    %c239_i32 = arith.constant 239 : i32
    %70 = tpu.dynamic_rotate %1 by %c239_i32 dim 1 : vector<4x256xf32>, i32 -> vector<4x256xf32>
    %71 = vector.broadcast %17 : vector<1x256xf32> to vector<4x256xf32>
    %72 = arith.mulf %70, %71 : vector<4x256xf32>
    %c8_49 = arith.constant 8 : index
    %c0_50 = arith.constant 0 : index
    %c0_51 = arith.constant 0 : index
    %73 = vector.load %arg4[%c8_49, %c0_50, %c0_51] : memref<9x4x4xf32, #tpu.memory_space<vmem>>, vector<1x4x4xf32>
    %74 = vector.shape_cast %73 : vector<1x4x4xf32> to vector<4x4xf32>
    %cst_52 = arith.constant dense<0.000000e+00> : vector<4x256xf32>
    %75 = tpu.matmul %74, %72, %cst_52 {dimension_numbers = #tpu.dot_dimension_numbers<[1], [0], [0], [1], [0, 0, 1, 1], [], []>} : vector<4x4xf32>, vector<4x256xf32>, vector<4x256xf32> -> vector<4x256xf32>
    %76 = arith.addf %69, %75 : vector<4x256xf32>
    %cst_53 = arith.constant dense<0.000000e+00> : vector<4xf32>
    %77 = vector.multi_reduction <add>, %76, %cst_53 [1] : vector<4x256xf32> to vector<4xf32>
    %78 = vector.shape_cast %77 : vector<4xf32> to vector<4x1xf32>
    %79 = arith.mulf %76, %76 : vector<4x256xf32>
    %cst_54 = arith.constant dense<0.000000e+00> : vector<4xf32>
    %80 = vector.multi_reduction <add>, %79, %cst_54 [1] : vector<4x256xf32> to vector<4xf32>
    %81 = vector.shape_cast %80 : vector<4xf32> to vector<4x1xf32>
    %cst_55 = arith.constant 3.906250e-03 : f32
    %82 = vector.broadcast %cst_55 : f32 to vector<4x1xf32>
    %83 = arith.mulf %78, %82 : vector<4x1xf32>
    %cst_56 = arith.constant 3.906250e-03 : f32
    %84 = vector.broadcast %cst_56 : f32 to vector<4x1xf32>
    %85 = arith.mulf %81, %84 : vector<4x1xf32>
    %86 = arith.mulf %83, %83 : vector<4x1xf32>
    %87 = arith.subf %85, %86 : vector<4x1xf32>
    %cst_57 = arith.constant 0.000000e+00 : f32
    %88 = vector.broadcast %cst_57 : f32 to vector<4x1xf32>
    %89 = arith.maximumf %87, %88 : vector<4x1xf32>
    %90 = vector.broadcast %83 : vector<4x1xf32> to vector<4x256xf32>
    %91 = arith.subf %76, %90 : vector<4x256xf32>
    %cst_58 = arith.constant 9.99999974E-6 : f32
    %92 = vector.broadcast %cst_58 : f32 to vector<4x1xf32>
    %93 = arith.addf %89, %92 : vector<4x1xf32>
    %94 = math.rsqrt %93 : vector<4x1xf32>
    %95 = vector.broadcast %94 : vector<4x1xf32> to vector<4x256xf32>
    %96 = arith.mulf %91, %95 : vector<4x256xf32>
    %c0_59 = arith.constant 0 : index
    %c0_60 = arith.constant 0 : index
    %c0_61 = arith.constant 0 : index
    %c0_62 = arith.constant 0 : index
    %97 = vector.load %arg2[%c0_59, %c0_60, %c0_61, %c0_62] : memref<1x6x4x1xf32, #tpu.memory_space<vmem>>, vector<1x1x4x1xf32>
    %98 = vector.shape_cast %97 : vector<1x1x4x1xf32> to vector<4x1xf32>
    %c0_63 = arith.constant 0 : index
    %c1_64 = arith.constant 1 : index
    %c0_65 = arith.constant 0 : index
    %c0_66 = arith.constant 0 : index
    %99 = vector.load %arg2[%c0_63, %c1_64, %c0_65, %c0_66] : memref<1x6x4x1xf32, #tpu.memory_space<vmem>>, vector<1x1x4x1xf32>
    %100 = vector.shape_cast %99 : vector<1x1x4x1xf32> to vector<4x1xf32>
    %cst_67 = arith.constant 1.000000e+00 : f32
    %101 = vector.broadcast %cst_67 : f32 to vector<4x1xf32>
    %102 = arith.addf %101, %98 : vector<4x1xf32>
    %103 = vector.broadcast %102 : vector<4x1xf32> to vector<4x256xf32>
    %104 = arith.mulf %103, %96 : vector<4x256xf32>
    %105 = vector.broadcast %100 : vector<4x1xf32> to vector<4x256xf32>
    %106 = arith.addf %104, %105 : vector<4x256xf32>
    %cst_68 = arith.constant 5.000000e-01 : f32
    %107 = vector.broadcast %cst_68 : f32 to vector<4x256xf32>
    %108 = arith.mulf %107, %106 : vector<4x256xf32>
    %cst_69 = arith.constant 4.471500e-02 : f32
    %109 = vector.broadcast %cst_69 : f32 to vector<4x256xf32>
    %110 = arith.mulf %109, %106 : vector<4x256xf32>
    %111 = arith.mulf %110, %106 : vector<4x256xf32>
    %112 = arith.mulf %111, %106 : vector<4x256xf32>
    %113 = arith.addf %106, %112 : vector<4x256xf32>
    %cst_70 = arith.constant 0.797884583 : f32
    %114 = vector.broadcast %cst_70 : f32 to vector<4x256xf32>
    %115 = arith.mulf %114, %113 : vector<4x256xf32>
    %116 = math.tanh %115 : vector<4x256xf32>
    %cst_71 = arith.constant 1.000000e+00 : f32
    %117 = vector.broadcast %cst_71 : f32 to vector<4x256xf32>
    %118 = arith.addf %117, %116 : vector<4x256xf32>
    %119 = arith.mulf %108, %118 : vector<4x256xf32>
    %c17_i32_72 = arith.constant 17 : i32
    %120 = tpu.dynamic_rotate %119 by %c17_i32_72 dim 1 : vector<4x256xf32>, i32 -> vector<4x256xf32>
    %121 = vector.broadcast %3 : vector<1x256xf32> to vector<4x256xf32>
    %122 = arith.mulf %120, %121 : vector<4x256xf32>
    %c0_73 = arith.constant 0 : index
    %c0_74 = arith.constant 0 : index
    %c0_75 = arith.constant 0 : index
    %123 = vector.load %arg5[%c0_73, %c0_74, %c0_75] : memref<9x4x4xf32, #tpu.memory_space<vmem>>, vector<1x4x4xf32>
    %124 = vector.shape_cast %123 : vector<1x4x4xf32> to vector<4x4xf32>
    %cst_76 = arith.constant dense<0.000000e+00> : vector<4x256xf32>
    %125 = tpu.matmul %124, %122, %cst_76 {dimension_numbers = #tpu.dot_dimension_numbers<[1], [0], [0], [1], [0, 0, 1, 1], [], []>} : vector<4x4xf32>, vector<4x256xf32>, vector<4x256xf32> -> vector<4x256xf32>
    %c16_i32_77 = arith.constant 16 : i32
    %126 = tpu.dynamic_rotate %119 by %c16_i32_77 dim 1 : vector<4x256xf32>, i32 -> vector<4x256xf32>
    %127 = vector.broadcast %5 : vector<1x256xf32> to vector<4x256xf32>
    %128 = arith.mulf %126, %127 : vector<4x256xf32>
    %c1_78 = arith.constant 1 : index
    %c0_79 = arith.constant 0 : index
    %c0_80 = arith.constant 0 : index
    %129 = vector.load %arg5[%c1_78, %c0_79, %c0_80] : memref<9x4x4xf32, #tpu.memory_space<vmem>>, vector<1x4x4xf32>
    %130 = vector.shape_cast %129 : vector<1x4x4xf32> to vector<4x4xf32>
    %cst_81 = arith.constant dense<0.000000e+00> : vector<4x256xf32>
    %131 = tpu.matmul %130, %128, %cst_81 {dimension_numbers = #tpu.dot_dimension_numbers<[1], [0], [0], [1], [0, 0, 1, 1], [], []>} : vector<4x4xf32>, vector<4x256xf32>, vector<4x256xf32> -> vector<4x256xf32>
    %132 = arith.addf %125, %131 : vector<4x256xf32>
    %c15_i32_82 = arith.constant 15 : i32
    %133 = tpu.dynamic_rotate %119 by %c15_i32_82 dim 1 : vector<4x256xf32>, i32 -> vector<4x256xf32>
    %134 = vector.broadcast %7 : vector<1x256xf32> to vector<4x256xf32>
    %135 = arith.mulf %133, %134 : vector<4x256xf32>
    %c2_83 = arith.constant 2 : index
    %c0_84 = arith.constant 0 : index
    %c0_85 = arith.constant 0 : index
    %136 = vector.load %arg5[%c2_83, %c0_84, %c0_85] : memref<9x4x4xf32, #tpu.memory_space<vmem>>, vector<1x4x4xf32>
    %137 = vector.shape_cast %136 : vector<1x4x4xf32> to vector<4x4xf32>
    %cst_86 = arith.constant dense<0.000000e+00> : vector<4x256xf32>
    %138 = tpu.matmul %137, %135, %cst_86 {dimension_numbers = #tpu.dot_dimension_numbers<[1], [0], [0], [1], [0, 0, 1, 1], [], []>} : vector<4x4xf32>, vector<4x256xf32>, vector<4x256xf32> -> vector<4x256xf32>
    %139 = arith.addf %132, %138 : vector<4x256xf32>
    %c1_i32_87 = arith.constant 1 : i32
    %140 = tpu.dynamic_rotate %119 by %c1_i32_87 dim 1 : vector<4x256xf32>, i32 -> vector<4x256xf32>
    %141 = vector.broadcast %9 : vector<1x256xf32> to vector<4x256xf32>
    %142 = arith.mulf %140, %141 : vector<4x256xf32>
    %c3_88 = arith.constant 3 : index
    %c0_89 = arith.constant 0 : index
    %c0_90 = arith.constant 0 : index
    %143 = vector.load %arg5[%c3_88, %c0_89, %c0_90] : memref<9x4x4xf32, #tpu.memory_space<vmem>>, vector<1x4x4xf32>
    %144 = vector.shape_cast %143 : vector<1x4x4xf32> to vector<4x4xf32>
    %cst_91 = arith.constant dense<0.000000e+00> : vector<4x256xf32>
    %145 = tpu.matmul %144, %142, %cst_91 {dimension_numbers = #tpu.dot_dimension_numbers<[1], [0], [0], [1], [0, 0, 1, 1], [], []>} : vector<4x4xf32>, vector<4x256xf32>, vector<4x256xf32> -> vector<4x256xf32>
    %146 = arith.addf %139, %145 : vector<4x256xf32>
    %c4_92 = arith.constant 4 : index
    %c0_93 = arith.constant 0 : index
    %c0_94 = arith.constant 0 : index
    %147 = vector.load %arg5[%c4_92, %c0_93, %c0_94] : memref<9x4x4xf32, #tpu.memory_space<vmem>>, vector<1x4x4xf32>
    %148 = vector.shape_cast %147 : vector<1x4x4xf32> to vector<4x4xf32>
    %cst_95 = arith.constant dense<0.000000e+00> : vector<4x256xf32>
    %149 = tpu.matmul %148, %119, %cst_95 {dimension_numbers = #tpu.dot_dimension_numbers<[1], [0], [0], [1], [0, 0, 1, 1], [], []>} : vector<4x4xf32>, vector<4x256xf32>, vector<4x256xf32> -> vector<4x256xf32>
    %150 = arith.addf %146, %149 : vector<4x256xf32>
    %c255_i32_96 = arith.constant 255 : i32
    %151 = tpu.dynamic_rotate %119 by %c255_i32_96 dim 1 : vector<4x256xf32>, i32 -> vector<4x256xf32>
    %152 = vector.broadcast %11 : vector<1x256xf32> to vector<4x256xf32>
    %153 = arith.mulf %151, %152 : vector<4x256xf32>
    %c5_97 = arith.constant 5 : index
    %c0_98 = arith.constant 0 : index
    %c0_99 = arith.constant 0 : index
    %154 = vector.load %arg5[%c5_97, %c0_98, %c0_99] : memref<9x4x4xf32, #tpu.memory_space<vmem>>, vector<1x4x4xf32>
    %155 = vector.shape_cast %154 : vector<1x4x4xf32> to vector<4x4xf32>
    %cst_100 = arith.constant dense<0.000000e+00> : vector<4x256xf32>
    %156 = tpu.matmul %155, %153, %cst_100 {dimension_numbers = #tpu.dot_dimension_numbers<[1], [0], [0], [1], [0, 0, 1, 1], [], []>} : vector<4x4xf32>, vector<4x256xf32>, vector<4x256xf32> -> vector<4x256xf32>
    %157 = arith.addf %150, %156 : vector<4x256xf32>
    %c241_i32_101 = arith.constant 241 : i32
    %158 = tpu.dynamic_rotate %119 by %c241_i32_101 dim 1 : vector<4x256xf32>, i32 -> vector<4x256xf32>
    %159 = vector.broadcast %13 : vector<1x256xf32> to vector<4x256xf32>
    %160 = arith.mulf %158, %159 : vector<4x256xf32>
    %c6_102 = arith.constant 6 : index
    %c0_103 = arith.constant 0 : index
    %c0_104 = arith.constant 0 : index
    %161 = vector.load %arg5[%c6_102, %c0_103, %c0_104] : memref<9x4x4xf32, #tpu.memory_space<vmem>>, vector<1x4x4xf32>
    %162 = vector.shape_cast %161 : vector<1x4x4xf32> to vector<4x4xf32>
    %cst_105 = arith.constant dense<0.000000e+00> : vector<4x256xf32>
    %163 = tpu.matmul %162, %160, %cst_105 {dimension_numbers = #tpu.dot_dimension_numbers<[1], [0], [0], [1], [0, 0, 1, 1], [], []>} : vector<4x4xf32>, vector<4x256xf32>, vector<4x256xf32> -> vector<4x256xf32>
    %164 = arith.addf %157, %163 : vector<4x256xf32>
    %c240_i32_106 = arith.constant 240 : i32
    %165 = tpu.dynamic_rotate %119 by %c240_i32_106 dim 1 : vector<4x256xf32>, i32 -> vector<4x256xf32>
    %166 = vector.broadcast %15 : vector<1x256xf32> to vector<4x256xf32>
    %167 = arith.mulf %165, %166 : vector<4x256xf32>
    %c7_107 = arith.constant 7 : index
    %c0_108 = arith.constant 0 : index
    %c0_109 = arith.constant 0 : index
    %168 = vector.load %arg5[%c7_107, %c0_108, %c0_109] : memref<9x4x4xf32, #tpu.memory_space<vmem>>, vector<1x4x4xf32>
    %169 = vector.shape_cast %168 : vector<1x4x4xf32> to vector<4x4xf32>
    %cst_110 = arith.constant dense<0.000000e+00> : vector<4x256xf32>
    %170 = tpu.matmul %169, %167, %cst_110 {dimension_numbers = #tpu.dot_dimension_numbers<[1], [0], [0], [1], [0, 0, 1, 1], [], []>} : vector<4x4xf32>, vector<4x256xf32>, vector<4x256xf32> -> vector<4x256xf32>
    %171 = arith.addf %164, %170 : vector<4x256xf32>
    %c239_i32_111 = arith.constant 239 : i32
    %172 = tpu.dynamic_rotate %119 by %c239_i32_111 dim 1 : vector<4x256xf32>, i32 -> vector<4x256xf32>
    %173 = vector.broadcast %17 : vector<1x256xf32> to vector<4x256xf32>
    %174 = arith.mulf %172, %173 : vector<4x256xf32>
    %c8_112 = arith.constant 8 : index
    %c0_113 = arith.constant 0 : index
    %c0_114 = arith.constant 0 : index
    %175 = vector.load %arg5[%c8_112, %c0_113, %c0_114] : memref<9x4x4xf32, #tpu.memory_space<vmem>>, vector<1x4x4xf32>
    %176 = vector.shape_cast %175 : vector<1x4x4xf32> to vector<4x4xf32>
    %cst_115 = arith.constant dense<0.000000e+00> : vector<4x256xf32>
    %177 = tpu.matmul %176, %174, %cst_115 {dimension_numbers = #tpu.dot_dimension_numbers<[1], [0], [0], [1], [0, 0, 1, 1], [], []>} : vector<4x4xf32>, vector<4x256xf32>, vector<4x256xf32> -> vector<4x256xf32>
    %178 = arith.addf %171, %177 : vector<4x256xf32>
    %cst_116 = arith.constant dense<0.000000e+00> : vector<4xf32>
    %179 = vector.multi_reduction <add>, %178, %cst_116 [1] : vector<4x256xf32> to vector<4xf32>
    %180 = vector.shape_cast %179 : vector<4xf32> to vector<4x1xf32>
    %181 = arith.mulf %178, %178 : vector<4x256xf32>
    %cst_117 = arith.constant dense<0.000000e+00> : vector<4xf32>
    %182 = vector.multi_reduction <add>, %181, %cst_117 [1] : vector<4x256xf32> to vector<4xf32>
    %183 = vector.shape_cast %182 : vector<4xf32> to vector<4x1xf32>
    %cst_118 = arith.constant 3.906250e-03 : f32
    %184 = vector.broadcast %cst_118 : f32 to vector<4x1xf32>
    %185 = arith.mulf %180, %184 : vector<4x1xf32>
    %cst_119 = arith.constant 3.906250e-03 : f32
    %186 = vector.broadcast %cst_119 : f32 to vector<4x1xf32>
    %187 = arith.mulf %183, %186 : vector<4x1xf32>
    %188 = arith.mulf %185, %185 : vector<4x1xf32>
    %189 = arith.subf %187, %188 : vector<4x1xf32>
    %cst_120 = arith.constant 0.000000e+00 : f32
    %190 = vector.broadcast %cst_120 : f32 to vector<4x1xf32>
    %191 = arith.maximumf %189, %190 : vector<4x1xf32>
    %192 = vector.broadcast %185 : vector<4x1xf32> to vector<4x256xf32>
    %193 = arith.subf %178, %192 : vector<4x256xf32>
    %cst_121 = arith.constant 9.99999974E-6 : f32
    %194 = vector.broadcast %cst_121 : f32 to vector<4x1xf32>
    %195 = arith.addf %191, %194 : vector<4x1xf32>
    %196 = math.rsqrt %195 : vector<4x1xf32>
    %197 = vector.broadcast %196 : vector<4x1xf32> to vector<4x256xf32>
    %198 = arith.mulf %193, %197 : vector<4x256xf32>
    %c0_122 = arith.constant 0 : index
    %c2_123 = arith.constant 2 : index
    %c0_124 = arith.constant 0 : index
    %c0_125 = arith.constant 0 : index
    %199 = vector.load %arg2[%c0_122, %c2_123, %c0_124, %c0_125] : memref<1x6x4x1xf32, #tpu.memory_space<vmem>>, vector<1x1x4x1xf32>
    %200 = vector.shape_cast %199 : vector<1x1x4x1xf32> to vector<4x1xf32>
    %c0_126 = arith.constant 0 : index
    %c3_127 = arith.constant 3 : index
    %c0_128 = arith.constant 0 : index
    %c0_129 = arith.constant 0 : index
    %201 = vector.load %arg2[%c0_126, %c3_127, %c0_128, %c0_129] : memref<1x6x4x1xf32, #tpu.memory_space<vmem>>, vector<1x1x4x1xf32>
    %202 = vector.shape_cast %201 : vector<1x1x4x1xf32> to vector<4x1xf32>
    %cst_130 = arith.constant 1.000000e+00 : f32
    %203 = vector.broadcast %cst_130 : f32 to vector<4x1xf32>
    %204 = arith.addf %203, %200 : vector<4x1xf32>
    %205 = vector.broadcast %204 : vector<4x1xf32> to vector<4x256xf32>
    %206 = arith.mulf %205, %198 : vector<4x256xf32>
    %207 = vector.broadcast %202 : vector<4x1xf32> to vector<4x256xf32>
    %208 = arith.addf %206, %207 : vector<4x256xf32>
    %209 = arith.addf %1, %208 : vector<4x256xf32>
    %cst_131 = arith.constant 5.000000e-01 : f32
    %210 = vector.broadcast %cst_131 : f32 to vector<4x256xf32>
    %211 = arith.mulf %210, %209 : vector<4x256xf32>
    %cst_132 = arith.constant 4.471500e-02 : f32
    %212 = vector.broadcast %cst_132 : f32 to vector<4x256xf32>
    %213 = arith.mulf %212, %209 : vector<4x256xf32>
    %214 = arith.mulf %213, %209 : vector<4x256xf32>
    %215 = arith.mulf %214, %209 : vector<4x256xf32>
    %216 = arith.addf %209, %215 : vector<4x256xf32>
    %cst_133 = arith.constant 0.797884583 : f32
    %217 = vector.broadcast %cst_133 : f32 to vector<4x256xf32>
    %218 = arith.mulf %217, %216 : vector<4x256xf32>
    %219 = math.tanh %218 : vector<4x256xf32>
    %cst_134 = arith.constant 1.000000e+00 : f32
    %220 = vector.broadcast %cst_134 : f32 to vector<4x256xf32>
    %221 = arith.addf %220, %219 : vector<4x256xf32>
    %222 = arith.mulf %211, %221 : vector<4x256xf32>
    %cst_135 = arith.constant dense<0.000000e+00> : vector<4xf32>
    %223 = vector.multi_reduction <add>, %222, %cst_135 [1] : vector<4x256xf32> to vector<4xf32>
    %224 = vector.shape_cast %223 : vector<4xf32> to vector<4x1xf32>
    %225 = arith.mulf %222, %222 : vector<4x256xf32>
    %cst_136 = arith.constant dense<0.000000e+00> : vector<4xf32>
    %226 = vector.multi_reduction <add>, %225, %cst_136 [1] : vector<4x256xf32> to vector<4xf32>
    %227 = vector.shape_cast %226 : vector<4xf32> to vector<4x1xf32>
    %cst_137 = arith.constant 3.906250e-03 : f32
    %228 = vector.broadcast %cst_137 : f32 to vector<4x1xf32>
    %229 = arith.mulf %224, %228 : vector<4x1xf32>
    %cst_138 = arith.constant 3.906250e-03 : f32
    %230 = vector.broadcast %cst_138 : f32 to vector<4x1xf32>
    %231 = arith.mulf %227, %230 : vector<4x1xf32>
    %232 = arith.mulf %229, %229 : vector<4x1xf32>
    %233 = arith.subf %231, %232 : vector<4x1xf32>
    %cst_139 = arith.constant 0.000000e+00 : f32
    %234 = vector.broadcast %cst_139 : f32 to vector<4x1xf32>
    %235 = arith.maximumf %233, %234 : vector<4x1xf32>
    %236 = vector.broadcast %229 : vector<4x1xf32> to vector<4x256xf32>
    %237 = arith.subf %222, %236 : vector<4x256xf32>
    %cst_140 = arith.constant 9.99999974E-6 : f32
    %238 = vector.broadcast %cst_140 : f32 to vector<4x1xf32>
    %239 = arith.addf %235, %238 : vector<4x1xf32>
    %240 = math.rsqrt %239 : vector<4x1xf32>
    %241 = vector.broadcast %240 : vector<4x1xf32> to vector<4x256xf32>
    %242 = arith.mulf %237, %241 : vector<4x256xf32>
    %c0_141 = arith.constant 0 : index
    %c4_142 = arith.constant 4 : index
    %c0_143 = arith.constant 0 : index
    %c0_144 = arith.constant 0 : index
    %243 = vector.load %arg2[%c0_141, %c4_142, %c0_143, %c0_144] : memref<1x6x4x1xf32, #tpu.memory_space<vmem>>, vector<1x1x4x1xf32>
    %244 = vector.shape_cast %243 : vector<1x1x4x1xf32> to vector<4x1xf32>
    %c0_145 = arith.constant 0 : index
    %c5_146 = arith.constant 5 : index
    %c0_147 = arith.constant 0 : index
    %c0_148 = arith.constant 0 : index
    %245 = vector.load %arg2[%c0_145, %c5_146, %c0_147, %c0_148] : memref<1x6x4x1xf32, #tpu.memory_space<vmem>>, vector<1x1x4x1xf32>
    %246 = vector.shape_cast %245 : vector<1x1x4x1xf32> to vector<4x1xf32>
    %cst_149 = arith.constant 1.000000e+00 : f32
    %247 = vector.broadcast %cst_149 : f32 to vector<4x1xf32>
    %248 = arith.addf %247, %244 : vector<4x1xf32>
    %249 = vector.broadcast %248 : vector<4x1xf32> to vector<4x256xf32>
    %250 = arith.mulf %249, %242 : vector<4x256xf32>
    %251 = vector.broadcast %246 : vector<4x1xf32> to vector<4x256xf32>
    %252 = arith.addf %250, %251 : vector<4x256xf32>
    %c0_150 = arith.constant 0 : index
    %c0_151 = arith.constant 0 : index
    %c0_152 = arith.constant 0 : index
    %253 = vector.load %arg6[%c0_150, %c0_151, %c0_152] : memref<1x4x256xf32, #tpu.memory_space<vmem>>, vector<1x4x256xf32>
    %254 = vector.shape_cast %253 : vector<1x4x256xf32> to vector<4x256xf32>
    %255 = vector.shape_cast %252 : vector<4x256xf32> to vector<1x4x256xf32>
    tpu.vector_store %arg6[%c0_150, %c0_151, %c0_152], %255 {strides = array<i32>} : memref<1x4x256xf32, #tpu.memory_space<vmem>>, vector<1x4x256xf32>,
    return
  }
  func.func @transform_0(%arg0: i32) -> (i32, i32, i32) {
    %c0_i32 = arith.constant 0 : i32
    %c0_i32_0 = arith.constant 0 : i32
    %c0_i32_1 = arith.constant 0 : i32
    return %arg0, %c0_i32, %c0_i32_0 : i32, i32, i32
  }
  func.func @transform_1(%arg0: i32) -> (i32, i32, i32, i32) {
    %c0_i32 = arith.constant 0 : i32
    %c0_i32_0 = arith.constant 0 : i32
    %c0_i32_1 = arith.constant 0 : i32
    %c0_i32_2 = arith.constant 0 : i32
    return %arg0, %c0_i32, %c0_i32_0, %c0_i32_1 : i32, i32, i32, i32
  }
  func.func @transform_2(%arg0: i32) -> (i32, i32, i32) {
    %c0_i32 = arith.constant 0 : i32
    %c0_i32_0 = arith.constant 0 : i32
    %c0_i32_1 = arith.constant 0 : i32
    %c0_i32_2 = arith.constant 0 : i32
    return %c0_i32, %c0_i32_0, %c0_i32_1 : i32, i32, i32
  }
  func.func @transform_3(%arg0: i32) -> (i32, i32, i32) {
    %c0_i32 = arith.constant 0 : i32
    %c0_i32_0 = arith.constant 0 : i32
    %c0_i32_1 = arith.constant 0 : i32
    %c0_i32_2 = arith.constant 0 : i32
    return %c0_i32, %c0_i32_0, %c0_i32_1 : i32, i32, i32
  }
  func.func @transform_4(%arg0: i32) -> (i32, i32, i32) {
    %c0_i32 = arith.constant 0 : i32
    %c0_i32_0 = arith.constant 0 : i32
    %c0_i32_1 = arith.constant 0 : i32
    %c0_i32_2 = arith.constant 0 : i32
    return %c0_i32, %c0_i32_0, %c0_i32_1 : i32, i32, i32
  }
  func.func @transform_5(%arg0: i32) -> (i32, i32, i32) {
    %c0_i32 = arith.constant 0 : i32
    %c0_i32_0 = arith.constant 0 : i32
    %c0_i32_1 = arith.constant 0 : i32
    return %arg0, %c0_i32, %c0_i32_0 : i32, i32, i32
  }
}

</mosaic_0001>

<bundles_post_ra>
// kernel: basic_block_forward.2
= control target key start
LH: loop header
LB: loop body
LE: loop exit
PB: predicated region body
PF: predicated region fallthrough
CT: control target
= control target key end

     0   :  { %v284_v0 = vmov 0.0   ;;  %vm285_vm0 = vmmov 0   ;;  %vm38_vm1 = vcmask 261120   ;;  %vm112_vm2 = vcmask 189440   ;;  %s368_s1 = inlined_call_operand.vmem [shape: f32[32,24], index: 1, kind: input, shape index: {}]   ;;  %s369_s0 = inlined_call_operand.vmem [shape: f32[2,32], index: 0, kind: input, shape index: {}]   ;;  %s370_s2 = inlined_call_operand.vmem [shape: f32[1,24], index: 2, kind: input, shape index: {}]   ;;  %s371_s5 = inlined_call_operand.vmem [shape: f32[24,24], index: 5, kind: input, shape index: {}]   ;;  %s372_s3 = inlined_call_operand.vmem [shape: f32[1,24], index: 3, kind: input, shape index: {}]   ;;  %s373_s4 = inlined_call_operand.vmem [shape: f32[1,24], index: 4, kind: input, shape index: {}]   ;;  %s374_s6 = inlined_call_operand.vmem [shape: f32[1,24], index: 6, kind: input, shape index: {}]   ;;  %s375_s7 = inlined_call_operand.vmem [shape: f32[2,24], index: 7, kind: output, shape index: {}]  }
   0x1   :  { %258 = vmatprep.subr.mxu0 %v284_v0  ;;  %v30_v1 = vld [vmem:[%s368_s1 + $0x18] sm:$0xff]  ;;  %v29_v2 = vld [vmem:[%s368_s1 + $0x10] sm:$0xff]  ;;  %266 = vmatprep.mubr.msk.f32.mxu0 %vm285_vm0, %v284_v0  ;;  %v28_v3 = vld [vmem:[%s368_s1 + $0x8] sm:$0xff]  ;;  %vm164_vm3 = vcmask 195584  }
   0x2   :  { %259 = vmatpush3.msra.mxu0 %v30_v1  ;;  %269 = vmatprep.subr.mxu1 %v284_v0  ;;  %v27_v4 = vld [vmem:[%s368_s1] sm:$0xff]  ;;  %v156_v13 = vld [vmem:[%s371_s5 + $0x10] sm:$0xff]  ;;  %v155_v14 = vld [vmem:[%s371_s5 + $0x8] sm:$0xff] }
   0x3   :  { %260 = vmatprep.subr.mxu0 %v284_v0  ;;  %275 = vmatprep.mubr.msk.f32.mxu1 %vm285_vm0, %v284_v0  ;;  %v26_v5 = vld [vmem:[%s369_s0] sm:$0x3] }
   0x4   :  { %261 = vmatpush3.msra.mxu0 %v29_v2  ;;  %v243_v6 = vld [vmem:[%s370_s2] ss:$0 sm:$0xff]  ;;  %270 = vmatpush3.msra.mxu1 %v156_v13 }
   0x5   :  { %262 = vmatprep.subr.mxu0 %v284_v0  ;;  %271 = vmatprep.subr.mxu1 %v284_v0  ;;  %v154_v15 = vld [vmem:[%s371_s5] sm:$0xff] }
   0x6   :  { %263 = vmatpush3.msra.mxu0 %v28_v3  ;;  %272 = vmatpush3.msra.mxu1 %v155_v14  ;;  %v245_v26 = vld [vmem:[%s372_s3] ss:$0 sm:$0xff] }
   0x7   :  { %264 = vmatprep.subr.mxu0 %v284_v0  ;;  %273 = vmatprep.subr.mxu1 %v284_v0  ;;  %v246_v28 = vld [vmem:[%s373_s4] ss:$0 sm:$0xff] }
   0x8   :  { %265 = vmatpush3.msra.mxu0 %v27_v4  ;;  %274 = vmatpush3.msra.mxu1 %v154_v15  ;;  %v247_v40 = vld [vmem:[%s374_s6] ss:$0 sm:$0xff] }
   0x9   :  { %267 = vmatmul.mubr.msk.f32.vlgmr.msra.gmra.mxu0 %vm38_vm1, %v26_v5 }
  0xc9   :  { %v108_v7 = vpop.f32.mrf.mxu0 }
  0xca   :  { %v109_v8 = vadd.f32 %v243_v6, %v108_v7 }
  0xcb   :  { %v268_v9 = vpop.f32.mrf.mxu0 }
  0xcc   :  { %v113_v10 = vsel %vm112_vm2, %v109_v8, 0.0  ;;  %v116_v11 = vmul.f32 %v109_v8, %v109_v8 }
  0xcd   :  { %114 = vadd.xlane.f32.xlu0 %v113_v10 }
  0xce   :  { %v117_v12 = vsel %vm112_vm2, %v116_v11, 0.0 }
  0xd1   :  { %118 = vadd.xlane.f32.xlu0 %v117_v12 }
 0x156   :  { %v115_v16 = vpop.xlane.xlu0 %114 }
 0x157   :  { %v120_v17 = vmul.f32 0.041666668, %v115_v16 }
 0x159   :  { %v122_v19 = vmul.f32 %v120_v17, %v120_v17  ;;  %v125_v24 = vsub.f32 %v109_v8, %v120_v17 }
 0x15a   :  { %v119_v18 = vpop.xlane.xlu0 %118 }
 0x15b   :  { %v121_v20 = vmul.f32 0.041666668, %v119_v18 }
 0x15d   :  { %v123_v21 = vsub.f32 %v121_v20, %v122_v19 }
 0x15f   :  { %v124_v22 = vmax.f32 %v123_v21, 0.0 }
 0x161   :  { %v126_v23 = vadd.f32 1e-05, %v124_v22 }
 0x163   :  { %280 = vrsqrt.f32 %v126_v23 }
 0x170   :  { %v281_v25 = vpop.eup %280 }
 0x171   :  { %v128_v27 = vmul.f32 %v281_v25, %v125_v24 }
 0x173   :  { %v136_v29 = vmul.f32 %v245_v26, %v128_v27 }
 0x175   :  { %v144_v30 = vadd.f32 %v246_v28, %v136_v29 }
 0x177   :  { %v146_v31 = vmul.f32 0.044715, %v144_v30  ;;  %v145_v37 = vmul.f32 0.5, %v144_v30 }
 0x179   :  { %v147_v32 = vmul.f32 %v146_v31, %v144_v30 }
 0x17b   :  { %v148_v33 = vmul.f32 %v147_v32, %v144_v30 }
 0x17d   :  { %v149_v34 = vadd.f32 %v148_v33, %v144_v30 }
 0x17f   :  { %v150_v35 = vmul.f32 0.7978846, %v149_v34 }
 0x181   :  { %282 = vtanh.f32 %v150_v35 }
 0x18e   :  { %v283_v36 = vpop.eup %282 }
 0x18f   :  { %v152_v38 = vadd.f32 1.0, %v283_v36 }
 0x191   :  { %v153_v39 = vmul.f32 %v152_v38, %v145_v37 }
 0x193   :  { %276 = vmatmul.mubr.msk.f32.vlgmr.msra.gmra.mxu1 %vm164_vm3, %v153_v39 }
 0x253   :  { %v234_v41 = vpop.f32.mrf.mxu1 }
 0x254   :  { %v235_v42 = vadd.f32 %v247_v40, %v234_v41 }
 0x255   :  { %v277_v43 = vpop.f32.mrf.mxu1 }
 0x256   :  { %238 = vst.msk [vmem:[%s375_s7] sm:$0x3] %vm112_vm2, %v235_v42 }

// kernel: basic_block_forward.3
= control target key start
LH: loop header
LB: loop body
LE: loop exit
PB: predicated region body
PF: predicated region fallthrough
CT: control target
= control target key end

     0   :  { %s2425_s18 = smov 0   ;;  %s2843_s0 = inlined_call_operand.vmem [shape: f32[2,4,256], index: 0, kind: input, shape index: {}]   ;;  %s2844_s1 = inlined_call_operand.vmem [shape: f32[2,6,4,1], index: 1, kind: input, shape index: {}]   ;;  %s2845_s2 = inlined_call_operand.vmem [shape: f32[9,1,256], index: 2, kind: input, shape index: {}]   ;;  %s2846_s3 = inlined_call_operand.vmem [shape: f32[9,4,4], index: 3, kind: input, shape index: {}]   ;;  %s2847_s4 = inlined_call_operand.vmem [shape: f32[9,4,4], index: 4, kind: input, shape index: {}]   ;;  %s2848_s5 = inlined_call_operand.vmem [shape: f32[2,4,256], index: 5, kind: output, shape index: {}]  }
   0x1 LB: > { %s2245_s19 = sadd.s32 4294967295, %s2382_s18   ;;  %p2249_p0 = scmp.ge.s32.totalorder %s2382_s18, 1  ;;  %s2382_s18 = sphi %s2425_s18, %s15_s18  }
   0x2   : > { %p197_p1 = scmp.lt.s32.totalorder %s2382_s18, 3 }
   0x4   : > { %p198_p2 = pnand %p2249_p0, %p197_p1 }
   0x5   : > { %p230_p3 = scmp.lt.s32.totalorder (!%p198_p2), %s2245_s19, 1  ;;  %s2385_s24 = smov (!%p198_p2), 17  }
   0x6   : > { %201 = sbr.rel (%p198_p2) target bundleno = 1299 (0x513), region = 40  ;;  %s2386_s25 = smov (!%p198_p2), 16  }
   0x7   : > { %s2387_s26 = smov (!%p198_p2), 15   ;;  %s2388_s27 = smov (!%p198_p2), 1  }
   0x8   : > { %s2389_s28 = smov (!%p198_p2), 127   ;;  %s2390_s29 = smov (!%p198_p2), 113  }
   0x9   : > { %s2391_s30 = smov (!%p198_p2), 112   ;;  %s2392_s6 = smov (!%p198_p2), 111  }
   0xb   : > { %s2850_s19 = smov (!%p230_p3, %s2245_s19), 1  ;;  %v2384_v1 = vmov 0.0   ;;  %v268_v3 = vlaneseq  ;;  %v246_v8 = vld [vmem:[%s2845_s2] sm:$0x3]  ;;  %v2255_v13 = vld [vmem:[%s2845_s2 + $0x2] sm:$0x3] }
   0xc   : > { %s2339_s20 = sshll.u32 %s2850_s19, 3  ;;  %384 = vmatprep.mubr.f32.mxu0 %v2384_v1  ;;  %464 = vmatprep.mubr.f32.mxu1 %v2384_v1  ;;  %vm313_vm1 = vcmask 1043456   ;;  %v2256_v18 = vld [vmem:[%s2845_s2 + $0x4] sm:$0x3]  ;;  %v2257_v23 = vld [vmem:[%s2845_s2 + $0x6] sm:$0x3] }
   0xd   : > { %s234_s23 = scalar_lea.vmem %s2843_s0, %s2339_s20  ;;  %v2481_v4 = vshrl.u32 %v268_v3, 7  ;;  %v2483_v5 = vand.u32 127, %v268_v3  ;;  %v286_v24 = vld [vmem:[%s2846_s3] sm:$0xf]  ;;  %vm309_vm5 = vcmask 31744   ;;  %s2341_s13 = smul.u32 24, %s2850_s19 }
   0xe   : > { %v2441_v0 = vld [vmem:[%s234_s23] sm:$0xff]  ;;  %v2258_v37 = vld [vmem:[%s2845_s2 + $0xa] sm:$0x3]  ;;  %v2259_v49 = vld [vmem:[%s2845_s2 + $0xc] sm:$0x3]  ;;  %s244_s15 = scalar_lea.vmem %s2848_s5, %s2339_s20 }
   0xf   : > { %264 = vrot.lane.b32.xlu1 %v2441_v0, %s2385_s24  ;;  %287 = vrot.lane.b32.xlu0 %v2441_v0, %s2386_s25  ;;  %v2450_v2 = vcombine.high %v2441_v0, %v2441_v0  ;;  %v2486_v6 = vsub.s32 0, %v2481_v4  ;;  %v2489_v7 = vsub.s32 1, %v2481_v4  ;;  %vm270_vm0 = vcmp.lt.s32.totalorder %v2483_v5, 17  ;;  %v2262_v38 = vld [vmem:[%s2846_s3 + $0x4] sm:$0xf]  ;;  %s2692_s16 = scalar_lea.vmem %s2844_s1, %s2341_s13 }
  0x10   : > { %vm475_vm2 = vcmp.lt.s32.totalorder %v2483_v5, 15  ;;  %vm291_vm3 = vcmp.lt.s32.totalorder %v2483_v5, 16  ;;  %vm579_vm4 = vcmp.lt.s32.totalorder %v2483_v5, 1  ;;  %vm765_vm6 = vcmp.lt.s32.totalorder %v2483_v5, 127  ;;  %v2269_v50 = vld [vmem:[%s2846_s3 + $0x8] sm:$0xf] }
  0x11   : > { %v2496_v11 = vrot.slane %v246_v8, %v2486_v6  ;;  %v2499_v12 = vrot.slane %v246_v8, %v2489_v7  ;;  %v2516_v21 = vrot.slane %v2255_v13, %v2486_v6  ;;  %v2519_v22 = vrot.slane %v2255_v13, %v2489_v7  ;;  %v2273_v51 = vld [vmem:[%s2846_s3 + $0xc] sm:$0xf]  ;;  %v2277_v61 = vld [vmem:[%s2846_s3 + $0x10] sm:$0xf]  ;;  %v2281_v62 = vld [vmem:[%s2846_s3 + $0x14] sm:$0xf] }
  0x12   : > { %v2529_v25 = vrot.slane %v2256_v18, %v2486_v6  ;;  %v2532_v26 = vrot.slane %v2256_v18, %v2489_v7  ;;  %v2543_v32 = vrot.slane %v2257_v23, %v2486_v6  ;;  %v2550_v36 = vrot.slane %v2257_v23, %v2489_v7  ;;  %v2260_v60 = vld [vmem:[%s2845_s2 + $0xe] sm:$0x3] }
  0x13   : > { %471 = vrot.lane.b32.xlu0 %v2441_v0, %s2387_s26  ;;  %266 = vrot.lane.b32.xlu1 %v2450_v2, %s2385_s24  ;;  %v2569_v45 = vrot.slane %v2258_v37, %v2486_v6  ;;  %v2577_v48 = vrot.slane %v2258_v37, %v2489_v7  ;;  %v2599_v56 = vrot.slane %v2259_v49, %v2486_v6  ;;  %vm869_vm7 = vcmp.lt.s32.totalorder %v2483_v5, 113 }
  0x14   : > { %v2607_v59 = vrot.slane %v2259_v49, %v2489_v7  ;;  %vm973_vm8 = vcmp.lt.s32.totalorder %v2483_v5, 112  ;;  %vm1077_vm9 = vcmp.lt.s32.totalorder %v2483_v5, 111  ;;  %v2393_v37 = vmov 0  }
  0x15   : > { %2361 = vset.pattern.permute.xlu0 %v2393_v37  ;;  %2362 = vset.pattern.permute.xlu1 %v2393_v37  ;;  %v2297_v37 = vld [vmem:[%s2692_s16 + $0x4] sm:$0xf] }
  0x17   : > { %473 = vrot.lane.b32.xlu1 %v2450_v2, %s2387_s26  ;;  %289 = vrot.lane.b32.xlu0 %v2450_v2, %s2386_s25 }
  0x1b   : > { %577 = vrot.lane.b32.xlu1 %v2450_v2, %s2388_s27  ;;  %575 = vrot.lane.b32.xlu0 %v2441_v0, %s2388_s27 }
  0x1f   : > { %763 = vrot.lane.b32.xlu1 %v2450_v2, %s2389_s28  ;;  %761 = vrot.lane.b32.xlu0 %v2441_v0, %s2389_s28 }
  0x23   : > { %867 = vrot.lane.b32.xlu1 %v2450_v2, %s2390_s29  ;;  %865 = vrot.lane.b32.xlu0 %v2441_v0, %s2390_s29 }
  0x27   : > { %971 = vrot.lane.b32.xlu1 %v2450_v2, %s2391_s30  ;;  %969 = vrot.lane.b32.xlu0 %v2441_v0, %s2391_s30 }
  0x2b   : > { %1075 = vrot.lane.b32.xlu1 %v2450_v2, %s2392_s6  ;;  %1073 = vrot.lane.b32.xlu0 %v2441_v0, %s2392_s6 }
  0x81   : > { %v265_v9 = vpop.permute.xlu1 %264  ;;  %v288_v10 = vpop.permute.xlu0 %287 }
  0x85   : > { %v472_v14 = vpop.permute.xlu0 %471  ;;  %v267_v15 = vpop.permute.xlu1 %266 }
  0x86   : > { %v271_v16 = vsel %vm270_vm0, %v265_v9, %v267_v15  ;;  %v272_v17 = vsel %vm270_vm0, %v267_v15, %v265_v9  ;;  %v2629_v9 = vrot.slane %v2260_v60, %v2486_v6  ;;  %v2285_v15 = vld [vmem:[%s2846_s3 + $0x18] sm:$0xf] }
  0x87   : > { %v284_v19 = vmul.f32 %v2496_v11, %v272_v17  ;;  %v285_v20 = vmul.f32 %v2499_v12, %v271_v16  ;;  %v2261_v16 = vld [vmem:[%s2845_s2 + $0x10] sm:$0x3] }
  0x89   : > { %2266 = vmatprep.subr.msk.mxu1 %vm313_vm1, %v285_v20  ;;  %v474_v27 = vpop.permute.xlu1 %473  ;;  %v290_v28 = vpop.permute.xlu0 %289 }
  0x8a   : > { %v476_v29 = vsel %vm475_vm2, %v472_v14, %v474_v27  ;;  %v292_v30 = vsel %vm291_vm3, %v288_v10, %v290_v28  ;;  %v293_v31 = vsel %vm291_vm3, %v290_v28, %v288_v10  ;;  %2267 = vmatpush1.msk.msra.mxu1 %vm313_vm1, %v284_v19  ;;  %v477_v33 = vsel %vm475_vm2, %v474_v27, %v472_v14 }
  0x8b   : > { %v305_v34 = vmul.f32 %v2516_v21, %v293_v31  ;;  %v306_v35 = vmul.f32 %v2519_v22, %v292_v30  ;;  %2268 = vmatmul.mubr.msk.f32.vlgmr.msra.gmra.mxu1 %vm309_vm5, %v286_v24  ;;  %v490_v39 = vmul.f32 %v2532_v26, %v476_v29  ;;  %v489_v42 = vmul.f32 %v2529_v25, %v477_v33  ;;  %v2289_v29 = vld [vmem:[%s2846_s3 + $0x1c] sm:$0xf] }
  0x8c   : > { %670 = vmatprep.mubr.f32.mxu1 %v2384_v1  ;;  %v2637_v14 = vrot.slane %v2260_v60, %v2489_v7  ;;  %v2658_v27 = vrot.slane %v2261_v16, %v2486_v6  ;;  %v2661_v28 = vrot.slane %v2261_v16, %v2489_v7 }
  0x8d   : > { %v578_v40 = vpop.permute.xlu1 %577  ;;  %2263 = vmatprep.subr.msk.mxu0 %vm313_vm1, %v306_v35  ;;  %v576_v41 = vpop.permute.xlu0 %575  ;;  %v2293_v35 = vld [vmem:[%s2846_s3 + $0x20] sm:$0xf] }
  0x8e   : > { %v580_v43 = vsel %vm579_vm4, %v576_v41, %v578_v40  ;;  %v581_v44 = vsel %vm579_vm4, %v578_v40, %v576_v41  ;;  %2264 = vmatpush1.msk.msra.mxu0 %vm313_vm1, %v305_v34 }
  0x8f   : > { %v593_v46 = vmul.f32 %v2543_v32, %v581_v44  ;;  %v594_v47 = vmul.f32 %v2550_v36, %v580_v43  ;;  %2265 = vmatmul.mubr.msk.f32.vlgmr.msra.gmra.mxu0 %vm309_vm5, %v2262_v38  ;;  %2270 = vmatprep.subr.msk.mxu0 %vm313_vm1, %v490_v39 }
  0x90   : > { %2271 = vmatpush1.msk.msra.mxu0 %vm313_vm1, %v489_v42  ;;  %566 = vmatprep.mubr.f32.mxu0 %v2384_v1 }
  0x91   : > { %v764_v52 = vpop.permute.xlu1 %763  ;;  %2274 = vmatprep.subr.msk.mxu1 %vm313_vm1, %v594_v47  ;;  %v762_v53 = vpop.permute.xlu0 %761  ;;  %2278 = vmatprep.subr.msk.mxu0 %vm313_vm1, %v2450_v2 }
  0x92   : > { %v766_v54 = vsel %vm765_vm6, %v762_v53, %v764_v52  ;;  %v767_v55 = vsel %vm765_vm6, %v764_v52, %v762_v53  ;;  %2275 = vmatpush1.msk.msra.mxu1 %vm313_vm1, %v593_v46 }
  0x93   : > { %v779_v57 = vmul.f32 %v2569_v45, %v766_v54  ;;  %v780_v58 = vmul.f32 %v2577_v48, %v767_v55  ;;  %2272 = vmatmul.mubr.msk.f32.vlgmr.msra.gmra.mxu0 %vm309_vm5, %v2269_v50  ;;  %2276 = vmatmul.mubr.msk.f32.vlgmr.msra.gmra.mxu1 %vm309_vm5, %v2273_v51 }
  0x94   : > { %2279 = vmatpush1.msk.msra.mxu0 %vm313_vm1, %v2441_v0  ;;  %752 = vmatprep.mubr.f32.mxu0 %v2384_v1 }
  0x95   : > { %v868_v63 = vpop.permute.xlu1 %867  ;;  %2282 = vmatprep.subr.msk.mxu1 %vm313_vm1, %v780_v58  ;;  %v866_v2 = vpop.permute.xlu0 %865  ;;  %856 = vmatprep.mubr.f32.mxu1 %v2384_v1 }
  0x96   : > { %v870_v3 = vsel %vm869_vm7, %v866_v2, %v868_v63  ;;  %v871_v8 = vsel %vm869_vm7, %v868_v63, %v866_v2  ;;  %2283 = vmatpush1.msk.msra.mxu1 %vm313_vm1, %v779_v57 }
  0x97   : > { %v883_v10 = vmul.f32 %v2599_v56, %v870_v3  ;;  %v884_v13 = vmul.f32 %v2607_v59, %v871_v8  ;;  %2280 = vmatmul.mubr.msk.f32.vlgmr.msra.gmra.mxu0 %vm309_vm5, %v2277_v61  ;;  %2284 = vmatmul.mubr.msk.f32.vlgmr.msra.gmra.mxu1 %vm309_vm5, %v2281_v62 }
  0x98   : > { %960 = vmatprep.mubr.f32.mxu0 %v2384_v1  ;;  %1064 = vmatprep.mubr.f32.mxu1 %v2384_v1 }
  0x99   : > { %v972_v17 = vpop.permute.xlu1 %971  ;;  %2286 = vmatprep.subr.msk.mxu0 %vm313_vm1, %v884_v13  ;;  %v970_v18 = vpop.permute.xlu0 %969 }
  0x9a   : > { %v974_v19 = vsel %vm973_vm8, %v970_v18, %v972_v17  ;;  %v975_v20 = vsel %vm973_vm8, %v972_v17, %v970_v18  ;;  %2287 = vmatpush1.msk.msra.mxu0 %vm313_vm1, %v883_v10 }
  0x9b   : > { %v987_v23 = vmul.f32 %v2629_v9, %v974_v19  ;;  %v988_v24 = vmul.f32 %v2637_v14, %v975_v20  ;;  %2288 = vmatmul.mubr.msk.f32.vlgmr.msra.gmra.mxu0 %vm309_vm5, %v2285_v15 }
  0x9c   : > { %1168 = vmatprep.mubr.f32.mxu0 %v2384_v1 }
  0x9d   : > { %v1076_v30 = vpop.permute.xlu1 %1075  ;;  %2290 = vmatprep.subr.msk.mxu1 %vm313_vm1, %v988_v24  ;;  %v1074_v31 = vpop.permute.xlu0 %1073 }
  0x9e   : > { %v1078_v33 = vsel %vm1077_vm9, %v1074_v31, %v1076_v30  ;;  %v1079_v6 = vsel %vm1077_vm9, %v1076_v30, %v1074_v31  ;;  %2291 = vmatpush1.msk.msra.mxu1 %vm313_vm1, %v987_v23 }
  0x9f   : > { %v1091_v7 = vmul.f32 %v2658_v27, %v1078_v33  ;;  %v1092_v34 = vmul.f32 %v2661_v28, %v1079_v6  ;;  %2292 = vmatmul.mubr.msk.f32.vlgmr.msra.gmra.mxu1 %vm309_vm5, %v2289_v29 }
  0xa0   : > { %1328 = vmatprep.mubr.f32.mxu1 %v2384_v1 }
  0xa1   : > { %2294 = vmatprep.subr.msk.mxu0 %vm313_vm1, %v1092_v34 }
  0xa2   : > { %2295 = vmatpush1.msk.msra.mxu0 %vm313_vm1, %v1091_v7 }
  0xa3   : > { %2296 = vmatmul.mubr.msk.f32.vlgmr.msra.gmra.mxu0 %vm309_vm5, %v2293_v35  ;;  %v1200_v35 = vld [vmem:[%s2692_s16] sm:$0xf] }
  0xa4   : > { %1408 = vmatprep.mubr.f32.mxu0 %v2384_v1 }
 0x14b   : > { %v466_v38 = vpop.f32.mrf.mxu1 }
 0x14d   : > { %v468_v40 = vpop.f32.mrf.mxu1 }
 0x14f   : > { %v386_v39 = vpop.f32.mrf.mxu0 }
 0x150   : > { %v467_v41 = vadd.f32 %v466_v38, %v386_v39  ;;  %v1203_v38 = vadd.f32 1.0, %v1200_v35 }
 0x151   : > { %v388_v42 = vpop.f32.mrf.mxu0 }
 0x152   : > { %v469_v43 = vadd.f32 %v468_v40, %v388_v42 }
 0x153   : > { %v568_v44 = vpop.f32.mrf.mxu0  ;;  %v672_v46 = vpop.f32.mrf.mxu1 }
 0x154   : > { %v573_v47 = vadd.f32 %v568_v44, %v467_v41 }
 0x155   : > { %v570_v49 = vpop.f32.mrf.mxu0  ;;  %v674_v50 = vpop.f32.mrf.mxu1 }
 0x156   : > { %v574_v51 = vadd.f32 %v570_v49, %v469_v43  ;;  %v677_v52 = vadd.f32 %v672_v46, %v573_v47 }
 0x157   : > { %v754_v53 = vpop.f32.mrf.mxu0  ;;  %v858_v54 = vpop.f32.mrf.mxu1 }
 0x158   : > { %v678_v55 = vadd.f32 %v674_v50, %v574_v51  ;;  %v759_v57 = vadd.f32 %v754_v53, %v677_v52 }
 0x159   : > { %v756_v58 = vpop.f32.mrf.mxu0  ;;  %v860_v62 = vpop.f32.mrf.mxu1 }
 0x15a   : > { %v760_v60 = vadd.f32 %v756_v58, %v678_v55  ;;  %v863_v61 = vadd.f32 %v858_v54, %v759_v57 }
 0x15b   : > { %v962_v63 = vpop.f32.mrf.mxu0 }
 0x15c   : > { %v864_v2 = vadd.f32 %v860_v62, %v760_v60  ;;  %v967_v3 = vadd.f32 %v962_v63, %v863_v61 }
 0x15d   : > { %v964_v8 = vpop.f32.mrf.mxu0 }
 0x15e   : > { %v968_v15 = vadd.f32 %v964_v8, %v864_v2 }
 0x15f   : > { %v1066_v10 = vpop.f32.mrf.mxu1 }
 0x160   : > { %v1071_v16 = vadd.f32 %v1066_v10, %v967_v3 }
 0x161   : > { %v1068_v13 = vpop.f32.mrf.mxu1 }
 0x162   : > { %v1072_v18 = vadd.f32 %v1068_v13, %v968_v15 }
 0x163   : > { %v1170_v17 = vpop.f32.mrf.mxu0 }
 0x164   : > { %v1175_v19 = vadd.f32 %v1170_v17, %v1071_v16 }
 0x165   : > { %v1172_v20 = vpop.f32.mrf.mxu0 }
 0x166   : > { %v1176_v23 = vadd.f32 %v1172_v20, %v1072_v18  ;;  %v1182_v24 = vmul.f32 %v1175_v19, %v1175_v19  ;;  %v1177_v29 = vsel %vm313_vm1, %v1175_v19, 0.0 }
 0x168   : > { %v1178_v30 = vsel %vm313_vm1, %v1176_v23, 0.0  ;;  %v1183_v31 = vmul.f32 %v1176_v23, %v1176_v23  ;;  %v1184_v6 = vsel %vm313_vm1, %v1182_v24, 0.0 }
 0x169   : > { %v1179_v33 = vadd.f32 %v1178_v30, %v1177_v29 }
 0x16a   : > { %v1185_v7 = vsel %vm313_vm1, %v1183_v31, 0.0 }
 0x16b   : > { %1180 = vadd.xlane.f32.xlu0 %v1179_v33  ;;  %v1186_v34 = vadd.f32 %v1185_v7, %v1184_v6 }
 0x16d   : > { %1187 = vadd.xlane.f32.xlu1 %v1186_v34 }
 0x17e   : > { %1213 = vperm.xlu1 %2362, %v2297_v37  }
 0x181   : > { %1206 = vperm.xlu0 %2361, %v1203_v38   ;;  %v2298_v38 = vld [vmem:[%s2847_s4 + $0x4] sm:$0xf] }
 0x1f4   : > { %v1181_v39 = vpop.xlane.xlu0 %1180 }
 0x1f5   : > { %v1189_v40 = vmul.f32 0.00390625, %v1181_v39 }
 0x1f6   : > { %v1188_v41 = vpop.xlane.xlu1 %1187 }
 0x1f7   : > { %v1190_v42 = vmul.f32 0.00390625, %v1188_v41  ;;  %v1191_v43 = vmul.f32 %v1189_v40, %v1189_v40  ;;  %v1194_v49 = vsub.f32 %v1175_v19, %v1189_v40  ;;  %v1195_v50 = vsub.f32 %v1176_v23, %v1189_v40 }
 0x1f9   : > { %v1192_v44 = vsub.f32 %v1190_v42, %v1191_v43  ;;  %v1244_v43 = vld [vmem:[%s2847_s4] sm:$0xf] }
 0x1fa   : > { %v1214_v55 = vpop.permute.xlu1 %1213 }
 0x1fb   : > { %v1193_v46 = vmax.f32 %v1192_v44, 0.0 }
 0x1fc   : > { %v1207_v52 = vpop.permute.xlu0 %1206 }
 0x1fd   : > { %v1196_v47 = vadd.f32 1e-05, %v1193_v46 }
 0x1ff   : > { %2364 = vrsqrt.f32 %v1196_v47 }
 0x20c   : > { %v2365_v51 = vpop.eup %2364 }
 0x20d   : > { %v1198_v53 = vmul.f32 %v2365_v51, %v1194_v49  ;;  %v1199_v54 = vmul.f32 %v2365_v51, %v1195_v50 }
 0x20f   : > { %v1209_v57 = vmul.f32 %v1207_v52, %v1198_v53  ;;  %v1210_v58 = vmul.f32 %v1207_v52, %v1199_v54  ;;  %v2305_v52 = vld [vmem:[%s2847_s4 + $0x8] sm:$0xf] }
 0x211   : > { %v1216_v60 = vadd.f32 %v1214_v55, %v1209_v57  ;;  %v1217_v61 = vadd.f32 %v1214_v55, %v1210_v58  ;;  %v2313_v58 = vld [vmem:[%s2847_s4 + $0x10] sm:$0xf] }
 0x213   : > { %v1220_v62 = vmul.f32 0.044715, %v1216_v60  ;;  %v1221_v63 = vmul.f32 0.044715, %v1217_v61  ;;  %v1218_v20 = vmul.f32 0.5, %v1216_v60  ;;  %v1219_v30 = vmul.f32 0.5, %v1217_v61 }
 0x215   : > { %v1222_v2 = vmul.f32 %v1220_v62, %v1216_v60  ;;  %v1223_v3 = vmul.f32 %v1221_v63, %v1217_v61 }
 0x217   : > { %v1224_v8 = vmul.f32 %v1222_v2, %v1216_v60  ;;  %v1225_v10 = vmul.f32 %v1223_v3, %v1217_v61  ;;  %v2317_v2 = vld [vmem:[%s2847_s4 + $0x14] sm:$0xf] }
 0x219   : > { %v1226_v13 = vadd.f32 %v1224_v8, %v1216_v60  ;;  %v1227_v15 = vadd.f32 %v1225_v10, %v1217_v61 }
 0x21b   : > { %v1228_v16 = vmul.f32 0.7978846, %v1226_v13  ;;  %v1229_v17 = vmul.f32 0.7978846, %v1227_v15  ;;  %v2321_v15 = vld [vmem:[%s2847_s4 + $0x18] sm:$0xf] }
 0x21d   : > { %2366 = vtanh.f32 %v1228_v16 }
 0x21e   : > { %2368 = vtanh.f32 %v1229_v17 }
 0x22a   : > { %v2367_v18 = vpop.eup %2366 }
 0x22b   : > { %v2369_v19 = vpop.eup %2368  ;;  %v1232_v23 = vadd.f32 1.0, %v2367_v18 }
 0x22c   : > { %v1233_v24 = vadd.f32 1.0, %v2369_v19  ;;  %v2325_v19 = vld [vmem:[%s2847_s4 + $0x1c] sm:$0xf] }
 0x22d   : > { %v1234_v29 = vmul.f32 %v1232_v23, %v1218_v20 }
 0x22e   : > { %v1235_v31 = vmul.f32 %v1233_v24, %v1219_v30 }
 0x22f   : > { %1507 = vrot.lane.b32.xlu0 %v1234_v29, %s2388_s27  ;;  %1245 = vrot.lane.b32.xlu1 %v1234_v29, %s2386_s25 }
 0x233   : > { %1683 = vrot.lane.b32.xlu0 %v1234_v29, %s2389_s28  ;;  %1247 = vrot.lane.b32.xlu1 %v1235_v31, %s2386_s25 }
 0x237   : > { %1775 = vrot.lane.b32.xlu0 %v1234_v29, %s2390_s29  ;;  %1236 = vrot.lane.b32.xlu1 %v1234_v29, %s2385_s24 }
 0x23b   : > { %1867 = vrot.lane.b32.xlu0 %v1234_v29, %s2391_s30  ;;  %1238 = vrot.lane.b32.xlu1 %v1235_v31, %s2385_s24 }
 0x23f   : > { %1959 = vrot.lane.b32.xlu0 %v1234_v29, %s2392_s6  ;;  %1415 = vrot.lane.b32.xlu1 %v1234_v29, %s2387_s26 }
 0x243   : > { %1417 = vrot.lane.b32.xlu1 %v1235_v31, %s2387_s26 }
 0x247   : > { %1509 = vrot.lane.b32.xlu1 %v1235_v31, %s2388_s27 }
 0x24b   : > { %1685 = vrot.lane.b32.xlu1 %v1235_v31, %s2389_s28 }
 0x24f   : > { %1777 = vrot.lane.b32.xlu1 %v1235_v31, %s2390_s29 }
 0x253   : > { %1869 = vrot.lane.b32.xlu1 %v1235_v31, %s2391_s30 }
 0x257   : > { %1961 = vrot.lane.b32.xlu1 %v1235_v31, %s2392_s6 }
 0x2a1   : > { %v1246_v33 = vpop.permute.xlu1 %1245  ;;  %v1508_v44 = vpop.permute.xlu0 %1507 }
 0x2a5   : > { %v1248_v6 = vpop.permute.xlu1 %1247  ;;  %v1684_v49 = vpop.permute.xlu0 %1683 }
 0x2a6   : > { %v1249_v7 = vsel %vm291_vm3, %v1246_v33, %v1248_v6  ;;  %v1250_v34 = vsel %vm291_vm3, %v1248_v6, %v1246_v33 }
 0x2a7   : > { %v1251_v35 = vmul.f32 %v1250_v34, %v2516_v21  ;;  %v1252_v37 = vmul.f32 %v1249_v7, %v2519_v22 }
 0x2a9   : > { %2299 = vmatprep.subr.msk.mxu1 %vm313_vm1, %v1252_v37  ;;  %v1237_v39 = vpop.permute.xlu1 %1236  ;;  %v1776_v60 = vpop.permute.xlu0 %1775 }
 0x2aa   : > { %2300 = vmatpush1.msk.msra.mxu1 %vm313_vm1, %v1251_v35 }
 0x2ab   : > { %2301 = vmatmul.mubr.msk.f32.vlgmr.msra.gmra.mxu1 %vm309_vm5, %v2298_v38 }
 0x2ac   : > { %1498 = vmatprep.mubr.f32.mxu1 %v2384_v1 }
 0x2ad   : > { %v1239_v40 = vpop.permute.xlu1 %1238  ;;  %v1868_v8 = vpop.permute.xlu0 %1867 }
 0x2ae   : > { %v1240_v41 = vsel %vm270_vm0, %v1237_v39, %v1239_v40  ;;  %v1241_v21 = vsel %vm270_vm0, %v1239_v40, %v1237_v39 }
 0x2af   : > { %v1242_v22 = vmul.f32 %v1241_v21, %v2496_v11  ;;  %v1243_v42 = vmul.f32 %v1240_v41, %v2499_v12 }
 0x2b1   : > { %2302 = vmatprep.subr.msk.mxu0 %vm313_vm1, %v1243_v42  ;;  %v1416_v46 = vpop.permute.xlu1 %1415  ;;  %v1960_v20 = vpop.permute.xlu0 %1959 }
 0x2b2   : > { %2303 = vmatpush1.msk.msra.mxu0 %vm313_vm1, %v1242_v22 }
 0x2b3   : > { %2304 = vmatmul.mubr.msk.f32.vlgmr.msra.gmra.mxu0 %vm309_vm5, %v1244_v43 }
 0x2b4   : > { %1590 = vmatprep.mubr.f32.mxu0 %v2384_v1 }
 0x2b5   : > { %v1418_v47 = vpop.permute.xlu1 %1417 }
 0x2b6   : > { %v1419_v11 = vsel %vm475_vm2, %v1416_v46, %v1418_v47  ;;  %v1420_v12 = vsel %vm475_vm2, %v1418_v47, %v1416_v46 }
 0x2b7   : > { %v1421_v50 = vmul.f32 %v1420_v12, %v2529_v25  ;;  %v1422_v51 = vmul.f32 %v1419_v11, %v2532_v26  ;;  %v2309_v26 = vld [vmem:[%s2847_s4 + $0xc] sm:$0xf] }
 0x2b9   : > { %2306 = vmatprep.subr.msk.mxu1 %vm313_vm1, %v1422_v51  ;;  %v1510_v53 = vpop.permute.xlu1 %1509 }
 0x2ba   : > { %v1511_v54 = vsel %vm579_vm4, %v1508_v44, %v1510_v53  ;;  %v1512_v55 = vsel %vm579_vm4, %v1510_v53, %v1508_v44  ;;  %2307 = vmatpush1.msk.msra.mxu1 %vm313_vm1, %v1421_v50 }
 0x2bb   : > { %v1513_v57 = vmul.f32 %v1512_v55, %v2543_v32  ;;  %v1514_v25 = vmul.f32 %v1511_v54, %v2550_v36  ;;  %2314 = vmatprep.subr.msk.mxu1 %vm313_vm1, %v1235_v31  ;;  %2308 = vmatmul.mubr.msk.f32.vlgmr.msra.gmra.mxu1 %vm309_vm5, %v2305_v52 }
 0x2bc   : > { %2315 = vmatpush1.msk.msra.mxu1 %vm313_vm1, %v1234_v29  ;;  %1674 = vmatprep.mubr.f32.mxu1 %v2384_v1 }
 0x2bd   : > { %2310 = vmatprep.subr.msk.mxu0 %vm313_vm1, %v1514_v25  ;;  %v1686_v32 = vpop.permute.xlu1 %1685 }
 0x2be   : > { %v1687_v36 = vsel %vm765_vm6, %v1684_v49, %v1686_v32  ;;  %v1688_v61 = vsel %vm765_vm6, %v1686_v32, %v1684_v49  ;;  %2311 = vmatpush1.msk.msra.mxu0 %vm313_vm1, %v1513_v57 }
 0x2bf   : > { %v1689_v62 = vmul.f32 %v1687_v36, %v2569_v45  ;;  %v1690_v63 = vmul.f32 %v1688_v61, %v2577_v48  ;;  %2312 = vmatmul.mubr.msk.f32.vlgmr.msra.gmra.mxu0 %vm309_vm5, %v2309_v26  ;;  %2316 = vmatmul.mubr.msk.f32.vlgmr.msra.gmra.mxu1 %vm309_vm5, %v2313_v58 }
 0x2c0   : > { %1766 = vmatprep.mubr.f32.mxu0 %v2384_v1  ;;  %1858 = vmatprep.mubr.f32.mxu1 %v2384_v1 }
 0x2c1   : > { %2318 = vmatprep.subr.msk.mxu0 %vm313_vm1, %v1690_v63  ;;  %v1778_v3 = vpop.permute.xlu1 %1777 }
 0x2c2   : > { %v1779_v45 = vsel %vm869_vm7, %v1776_v60, %v1778_v3  ;;  %v1780_v48 = vsel %vm869_vm7, %v1778_v3, %v1776_v60  ;;  %2319 = vmatpush1.msk.msra.mxu0 %vm313_vm1, %v1689_v62  ;;  %v2333_v3 = vld [vmem:[%s2692_s16 + $0x8] sm:$0xf] }
 0x2c3   : > { %v1781_v10 = vmul.f32 %v1779_v45, %v2599_v56  ;;  %v1782_v13 = vmul.f32 %v1780_v48, %v2607_v59  ;;  %2320 = vmatmul.mubr.msk.f32.vlgmr.msra.gmra.mxu0 %vm309_vm5, %v2317_v2  ;;  %v2334_v45 = vld [vmem:[%s2692_s16 + $0xc] sm:$0xf]  ;;  %v2078_v48 = vadd.f32 1.0, %v2333_v3 }
 0x2c4   : > { %1950 = vmatprep.mubr.f32.mxu0 %v2384_v1 }
 0x2c5   : > { %2322 = vmatprep.subr.msk.mxu1 %vm313_vm1, %v1782_v13  ;;  %v1870_v16 = vpop.permute.xlu1 %1869 }
 0x2c6   : > { %v1871_v17 = vsel %vm973_vm8, %v1868_v8, %v1870_v16  ;;  %v1872_v18 = vsel %vm973_vm8, %v1870_v16, %v1868_v8  ;;  %2323 = vmatpush1.msk.msra.mxu1 %vm313_vm1, %v1781_v10 }
 0x2c7   : > { %v1873_v56 = vmul.f32 %v1871_v17, %v2629_v9  ;;  %v1874_v59 = vmul.f32 %v1872_v18, %v2637_v14  ;;  %2324 = vmatmul.mubr.msk.f32.vlgmr.msra.gmra.mxu1 %vm309_vm5, %v2321_v15 }
 0x2c8   : > { %2042 = vmatprep.mubr.f32.mxu1 %v2384_v1  ;;  %v2329_v1 = vld [vmem:[%s2847_s4 + $0x20] sm:$0xf] }
 0x2c9   : > { %2326 = vmatprep.subr.msk.mxu0 %vm313_vm1, %v1874_v59  ;;  %v1962_v23 = vpop.permute.xlu1 %1961 }
 0x2ca   : > { %v1963_v24 = vsel %vm1077_vm9, %v1960_v20, %v1962_v23  ;;  %v1964_v9 = vsel %vm1077_vm9, %v1962_v23, %v1960_v20  ;;  %2327 = vmatpush1.msk.msra.mxu0 %vm313_vm1, %v1873_v56 }
 0x2cb   : > { %v1965_v14 = vmul.f32 %v1963_v24, %v2658_v27  ;;  %v1966_v29 = vmul.f32 %v1964_v9, %v2661_v28  ;;  %2328 = vmatmul.mubr.msk.f32.vlgmr.msra.gmra.mxu0 %vm309_vm5, %v2325_v19 }
 0x2cd   : > { %2330 = vmatprep.subr.msk.mxu1 %vm313_vm1, %v1966_v29 }
 0x2ce   : > { %2331 = vmatpush1.msk.msra.mxu1 %vm313_vm1, %v1965_v14 }
 0x2cf   : > { %2332 = vmatmul.mubr.msk.f32.vlgmr.msra.gmra.mxu1 %vm309_vm5, %v2329_v1 }
 0x36b   : > { %v1330_v5 = vpop.f32.mrf.mxu1 }
 0x36d   : > { %v1332_v31 = vpop.f32.mrf.mxu1 }
 0x373   : > { %v1410_v30 = vpop.f32.mrf.mxu0 }
 0x374   : > { %v1411_v6 = vadd.f32 %v1410_v30, %v1330_v5 }
 0x375   : > { %v1412_v33 = vpop.f32.mrf.mxu0 }
 0x376   : > { %v1413_v27 = vadd.f32 %v1412_v33, %v1332_v31 }
 0x37b   : > { %v1500_v7 = vpop.f32.mrf.mxu1 }
 0x37c   : > { %v1505_v28 = vadd.f32 %v1500_v7, %v1411_v6 }
 0x37d   : > { %v1502_v34 = vpop.f32.mrf.mxu1 }
 0x37e   : > { %v1506_v35 = vadd.f32 %v1502_v34, %v1413_v27 }
 0x37f   : > { %v1592_v37 = vpop.f32.mrf.mxu0  ;;  %v1676_v38 = vpop.f32.mrf.mxu1 }
 0x380   : > { %v1597_v39 = vadd.f32 %v1592_v37, %v1505_v28 }
 0x381   : > { %v1594_v40 = vpop.f32.mrf.mxu0  ;;  %v1678_v22 = vpop.f32.mrf.mxu1 }
 0x382   : > { %v1598_v41 = vadd.f32 %v1594_v40, %v1506_v35  ;;  %v1681_v21 = vadd.f32 %v1676_v38, %v1597_v39 }
 0x383   : > { %v1768_v42 = vpop.f32.mrf.mxu0 }
 0x384   : > { %v1682_v43 = vadd.f32 %v1678_v22, %v1598_v41  ;;  %v1773_v44 = vadd.f32 %v1768_v42, %v1681_v21 }
 0x385   : > { %v1770_v46 = vpop.f32.mrf.mxu0 }
 0x386   : > { %v1774_v11 = vadd.f32 %v1770_v46, %v1682_v43 }
 0x387   : > { %v1860_v47 = vpop.f32.mrf.mxu1 }
 0x388   : > { %v1865_v12 = vadd.f32 %v1860_v47, %v1773_v44  ;;  %v2335_v47 = vld [vmem:[%s2692_s16 + $0x10] sm:$0xf] }
 0x389   : > { %v1862_v49 = vpop.f32.mrf.mxu1 }
 0x38a   : > { %v1866_v52 = vadd.f32 %v1862_v49, %v1774_v11  ;;  %v2336_v11 = vld [vmem:[%s2692_s16 + $0x14] sm:$0xf] }
 0x38b   : > { %v1952_v50 = vpop.f32.mrf.mxu0 }
 0x38c   : > { %v1957_v53 = vadd.f32 %v1952_v50, %v1865_v12  ;;  %v2155_v12 = vadd.f32 1.0, %v2335_v47 }
 0x38d   : > { %v1954_v51 = vpop.f32.mrf.mxu0 }
 0x38e   : > { %v1958_v55 = vadd.f32 %v1954_v51, %v1866_v52 }
 0x38f   : > { %v2044_v54 = vpop.f32.mrf.mxu1 }
 0x390   : > { %v2049_v57 = vadd.f32 %v2044_v54, %v1957_v53 }
 0x391   : > { %v2046_v25 = vpop.f32.mrf.mxu1 }
 0x392   : > { %v2050_v26 = vadd.f32 %v2046_v25, %v1958_v55  ;;  %v2056_v58 = vmul.f32 %v2049_v57, %v2049_v57  ;;  %v2051_v60 = vsel %vm313_vm1, %v2049_v57, 0.0 }
 0x394   : > { %v2052_v32 = vsel %vm313_vm1, %v2050_v26, 0.0  ;;  %v2057_v36 = vmul.f32 %v2050_v26, %v2050_v26  ;;  %v2058_v62 = vsel %vm313_vm1, %v2056_v58, 0.0 }
 0x395   : > { %v2053_v61 = vadd.f32 %v2052_v32, %v2051_v60 }
 0x396   : > { %v2059_v63 = vsel %vm313_vm1, %v2057_v36, 0.0 }
 0x397   : > { %2054 = vadd.xlane.f32.xlu0 %v2053_v61  ;;  %v2060_v2 = vadd.f32 %v2059_v63, %v2058_v62 }
 0x399   : > { %2061 = vadd.xlane.f32.xlu1 %v2060_v2 }
 0x3aa   : > { %2088 = vperm.xlu1 %2362, %v2334_v45  }
 0x3ad   : > { %2081 = vperm.xlu0 %2361, %v2078_v48  }
 0x420   : > { %v2055_v8 = vpop.xlane.xlu0 %2054 }
 0x421   : > { %v2063_v10 = vmul.f32 0.00390625, %v2055_v8 }
 0x422   : > { %v2062_v13 = vpop.xlane.xlu1 %2061 }
 0x423   : > { %v2064_v15 = vmul.f32 0.00390625, %v2062_v13  ;;  %v2065_v16 = vmul.f32 %v2063_v10, %v2063_v10  ;;  %v2068_v59 = vsub.f32 %v2049_v57, %v2063_v10  ;;  %v2069_v19 = vsub.f32 %v2050_v26, %v2063_v10 }
 0x424   : > { %v2394_v57 = vmov 839922192  }
 0x425   : > { %v2066_v17 = vsub.f32 %v2064_v15, %v2065_v16  ;;  %v2131_v25 = vunpack.c.l.s4 %v2394_v57 }
 0x426   : > { %v2089_v1 = vpop.permute.xlu1 %2088 }
 0x427   : > { %v2067_v18 = vmax.f32 %v2066_v17, 0.0  ;;  %v2132_v58 = vunpack.c.0.s8 %v2131_v25 }
 0x428   : > { %v2082_v9 = vpop.permute.xlu0 %2081 }
 0x429   : > { %v2070_v56 = vadd.f32 1e-05, %v2067_v18  ;;  %v2135_v60 = vsub.s32 %v2132_v58, %v2481_v4 }
 0x42b   : > { %2370 = vrsqrt.f32 %v2070_v56 }
 0x438   : > { %v2371_v20 = vpop.eup %2370 }
 0x439   : > { %v2072_v23 = vmul.f32 %v2371_v20, %v2068_v59  ;;  %v2073_v24 = vmul.f32 %v2371_v20, %v2069_v19 }
 0x43b   : > { %v2084_v14 = vmul.f32 %v2082_v9, %v2072_v23  ;;  %v2085_v29 = vmul.f32 %v2082_v9, %v2073_v24 }
 0x43d   : > { %v2091_v5 = vadd.f32 %v2089_v1, %v2084_v14  ;;  %v2092_v30 = vadd.f32 %v2089_v1, %v2085_v29 }
 0x43f   : > { %v2095_v31 = vcombine.low %v2091_v5, %v2092_v30 }
 0x441   : > { %v2097_v33 = vadd.f32 %v2095_v31, %v2441_v0 }
 0x443   : > { %v2099_v6 = vmul.f32 0.044715, %v2097_v33  ;;  %v2098_v37 = vmul.f32 0.5, %v2097_v33 }
 0x445   : > { %v2100_v27 = vmul.f32 %v2099_v6, %v2097_v33 }
 0x447   : > { %v2101_v7 = vmul.f32 %v2100_v27, %v2097_v33 }
 0x449   : > { %v2102_v28 = vadd.f32 %v2101_v7, %v2097_v33 }
 0x44b   : > { %v2103_v34 = vmul.f32 0.7978846, %v2102_v28 }
 0x44d   : > { %2372 = vtanh.f32 %v2103_v34 }
 0x45a   : > { %v2373_v35 = vpop.eup %2372 }
 0x45b   : > { %v2105_v38 = vadd.f32 1.0, %v2373_v35 }
 0x45d   : > { %v2106_v39 = vmul.f32 %v2105_v38, %v2098_v37 }
 0x45f   : > { %v2108_v40 = vcombine.high %v2106_v39, %v2106_v39  ;;  %v2115_v41 = vmul.f32 %v2106_v39, %v2106_v39  ;;  %v2110_v21 = vsel %vm313_vm1, %v2106_v39, 0.0 }
 0x461   : > { %v2111_v22 = vsel %vm313_vm1, %v2108_v40, 0.0  ;;  %v2117_v42 = vcombine.high %v2115_v41, %v2115_v41  ;;  %v2119_v43 = vsel %vm313_vm1, %v2115_v41, 0.0 }
 0x462   : > { %v2112_v0 = vadd.f32 %v2111_v22, %v2110_v21 }
 0x463   : > { %v2120_v44 = vsel %vm313_vm1, %v2117_v42, 0.0 }
 0x464   : > { %2113 = vadd.xlane.f32.xlu0 %v2112_v0  ;;  %v2121_v46 = vadd.f32 %v2120_v44, %v2119_v43 }
 0x466   : > { %2122 = vadd.xlane.f32.xlu1 %v2121_v46 }
 0x477   : > { %2168 = vperm.xlu1 %2362, %v2336_v11  }
 0x47a   : > { %2158 = vperm.xlu0 %2361, %v2155_v12  }
 0x4ed   : > { %v2114_v49 = vpop.xlane.xlu0 %2113 }
 0x4ee   : > { %v2124_v50 = vmul.f32 0.00390625, %v2114_v49 }
 0x4ef   : > { %v2123_v51 = vpop.xlane.xlu1 %2122 }
 0x4f0   : > { %v2126_v52 = vmul.f32 %v2124_v50, %v2124_v50  ;;  %v2125_v53 = vmul.f32 0.00390625, %v2123_v51  ;;  %v2136_v32 = vrot.slane %v2124_v50, %v2135_v60 }
 0x4f2   : > { %v2127_v54 = vsub.f32 %v2125_v53, %v2126_v52  ;;  %v2138_v61 = vsub.f32 %v2106_v39, %v2136_v32 }
 0x4f3   : > { %v2169_v8 = vpop.permute.xlu1 %2168 }
 0x4f4   : > { %v2128_v55 = vmax.f32 %v2127_v54, 0.0 }
 0x4f5   : > { %v2159_v2 = vpop.permute.xlu0 %2158 }
 0x4f6   : > { %v2139_v26 = vadd.f32 1e-05, %v2128_v55 }
 0x4f8   : > { %2374 = vrsqrt.f32 %v2139_v26 }
 0x505   : > { %v2375_v36 = vpop.eup %2374 }
 0x506   : > { %v2148_v62 = vrot.slane %v2375_v36, %v2135_v60 }
 0x508   : > { %v2150_v63 = vmul.f32 %v2148_v62, %v2138_v61 }
 0x50a   : > { %v2162_v3 = vcombine.high %v2150_v63, %v2150_v63  ;;  %v2164_v45 = vmul.f32 %v2159_v2, %v2150_v63 }
 0x50c   : > { %v2165_v48 = vmul.f32 %v2162_v3, %v2159_v2  ;;  %v2171_v10 = vadd.f32 %v2169_v8, %v2164_v45 }
 0x50e   : > { %v2172_v13 = vadd.f32 %v2169_v8, %v2165_v48 }
 0x510   : > { %v2175_v15 = vcombine.low %v2171_v10, %v2172_v13 }
 0x512   : > { %2177 = vst [vmem:[%s244_s15] sm:$0xff] %v2175_v15 }
 0x513 PF: > { %s15_s18 = sadd.s32 1, %s2382_s18  }
 0x514   : > { %p12_p4 = scmp.ge.s32.totalorder %s15_s18, 4  }
 0x516   :  { %14 = sbr.rel (!%p12_p4) target bundleno = 1 (0x1), region = 101 }

</bundles_post_ra>
